<compile_context>
chip_gen: v7x
topology: tpu7x:2x2x1
jax: 0.10.0
libtpu: 0.0.40
codegen_flags: <defaults>
</compile_context>

<pallas_src>
import math

import jax
import jax.numpy as jnp
from jax.experimental import pallas as pl
from jax.experimental.pallas import tpu as pltpu


def _round_up(x, m):
    return ((x + m - 1) // m) * m


# ---------------------------------------------------------------------------
# Pallas kernel: full MLP hot path, transposed layout (features x batch-tile)
# ---------------------------------------------------------------------------
def _pose_kernel(x_ref,
                 w0_ref, b0_ref,
                 w1_ref, b1_ref,
                 w2_ref, b2_ref,
                 w3_ref, b3_ref,
                 out_ref):
    # x_ref: [dim_in, tn] with tn a multiple of 128 (lanes = batch points).
    h = x_ref[...].astype(jnp.float32)

    # 3 SIREN layers.  sin_w0 is pre-folded into W/b, so: h = sin(W @ h + b).
    for w_r, b_r in ((w0_ref, b0_ref), (w1_ref, b1_ref), (w2_ref, b2_ref)):
        h = jnp.sin(jnp.dot(w_r[...], h, preferred_element_type=jnp.float32)
                    + b_r[...])

    # Final plain linear layer -> single lane-dense [dim_out, tn] store.
    out_ref[...] = (jnp.dot(w3_ref[...], h, preferred_element_type=jnp.float32)
                    + b3_ref[...]).astype(out_ref.dtype)


# ---------------------------------------------------------------------------
# Parameter prep: transpose to [out, in] and fold sin_w0 into SIREN layers.
# Call once; the result is what pose_extractor_forward consumes.
# ---------------------------------------------------------------------------
def prepare_kernel_params(params, sin_w0=2.0):
    """params: list of (W [in,out], b [1,out]).  Returns (W_T [out,in], b [out,1])."""
    prepped = []
    n = len(params)
    for idx, (W, b) in enumerate(params):
        W_t = jnp.asarray(W, jnp.float32).T                 # [out, in]
        b_t = jnp.asarray(b, jnp.float32).reshape(-1, 1)    # [out, 1]
        if idx < n - 1:                                      # SIREN layers only
            W_t = W_t * sin_w0
            b_t = b_t * sin_w0
        prepped.append((W_t, b_t))
    return prepped


# ---------------------------------------------------------------------------
# Wrapper
# ---------------------------------------------------------------------------
def pose_extractor_forward(x, kernel_params, *, tn=1024):
    """Run the PoseExtractor forward pass as a Pallas TPU kernel.

    x             : [N, dim_in] float32
    kernel_params : output of prepare_kernel_params
    returns       : (frequencies [N, dim_out//2], phase_shifts [N, dim_out//2])
    """
    N, dim_in = x.shape
    (w0, b0), (w1, b1), (w2, b2), (w3, b3) = kernel_params
    dim_out = w3.shape[0]
    half = dim_out // 2

    # Batch (lane) tile: as large as requested, but keep the grid length
    # around >= 8 for big N so v7x's 2 TensorCores both get pipelined steps.
    tn_eff = min(tn, max(128, _round_up(-(-N // 8), 128)))
    n_pad = _round_up(N, tn_eff)

    # Transpose once in the wrapper and zero-pad the batch remainder.
    x_t = jnp.pad(x.astype(jnp.float32).T, ((0, 0), (0, n_pad - N)))

    grid = (n_pad // tn_eff,)

    def full2d(arr):  # tiny weight/bias arrays: full-array block, VMEM-resident
        return pl.BlockSpec(arr.shape, lambda i: (0, 0))

    in_specs = [
        pl.BlockSpec((dim_in, tn_eff), lambda i: (0, i)),
        full2d(w0), full2d(b0),
        full2d(w1), full2d(b1),
        full2d(w2), full2d(b2),
        full2d(w3), full2d(b3),
    ]
    out_specs = pl.BlockSpec((dim_out, tn_eff), lambda i: (0, i))
    out_shape = jax.ShapeDtypeStruct((dim_out, n_pad), jnp.float32)

    out_t = pl.pallas_call(
        _pose_kernel,
        out_shape=out_shape,
        grid_spec=pltpu.PrefetchScalarGridSpec(
            num_scalar_prefetch=0,
            grid=grid,
            in_specs=in_specs,
            out_specs=out_specs,
        ),
        compiler_params=pltpu.CompilerParams(
            dimension_semantics=("parallel",)),
    )(x_t, w0, b0, w1, b1, w2, b2, w3, b3)

    # Cheap XLA postprocessing: drop padding, transpose back, split in half.
    out = out_t[:, :N].T                    # [N, dim_out]
    return out[:, :half], out[:, half:]


# ---------------------------------------------------------------------------
# Deterministic parameter init (mirrors nn.Linear default bias + sine_init wt)
# ---------------------------------------------------------------------------
def init_params(key, dim_in, dim_hidden, dim_out, D=3, sin_w0=2.0):
    dims = [dim_in] + [dim_hidden] * D + [dim_out]
    params = []
    for layer in range(len(dims) - 1):
        fan_in, fan_out = dims[layer], dims[layer + 1]
        key, kw, kb = jax.random.split(key, 3)
        # sine_init: uniform(-sqrt(6/fan_in)/w0, +sqrt(6/fan_in)/w0)
        w_bound = math.sqrt(6.0 / fan_in) / sin_w0
        W = jax.random.uniform(kw, (fan_in, fan_out), jnp.float32,
                               minval=-w_bound, maxval=w_bound)
        # nn.Linear default bias: uniform(-1/sqrt(fan_in), 1/sqrt(fan_in))
        b_bound = 1.0 / math.sqrt(fan_in)
        b = jax.random.uniform(kb, (1, fan_out), jnp.float32,
                               minval=-b_bound, maxval=b_bound)
        params.append((W, b))
    return params


# Pure-JAX reference (uses the original, un-folded params) for validation.
def reference_forward(x, params, sin_w0=2.0):
    h = x
    for (W, b) in params[:-1]:
        h = jnp.sin((h @ W + b) * sin_w0)
    W, b = params[-1]
    out = h @ W + b
    half = out.shape[-1] // 2
    return out[:, :half], out[:, half:]


if __name__ == "__main__":
    dim_in, dim_hidden, dim_out = 8, 32, 16
    N = 300                      # deliberately not a multiple of 128
    sin_w0 = 2.0

    key = jax.random.PRNGKey(0)
    key, kx = jax.random.split(key)
    x = jax.random.normal(kx, (N, dim_in), jnp.float32)
    params = init_params(key, dim_in, dim_hidden, dim_out, D=3, sin_w0=sin_w0)

    kparams = prepare_kernel_params(params, sin_w0=sin_w0)
    freq, phase = pose_extractor_forward(x, kparams)
    freq, phase = jax.block_until_ready((freq, phase))

    ref_freq, ref_phase = reference_forward(x, params, sin_w0=sin_w0)
    assert freq.shape == (N, dim_out // 2) and phase.shape == (N, dim_out // 2)
    assert jnp.allclose(freq, ref_freq, atol=1e-5, rtol=1e-5)
    assert jnp.allclose(phase, ref_phase, atol=1e-5, rtol=1e-5)

    print("KERNEL_OK")
</pallas_src>

<mosaic_0001>
module attributes {stable_mosaic.version = 11 : i64} {
  func.func @_pose_kernel(%arg0: i32, %arg1: memref<8x128xf32, #tpu.memory_space<vmem>>, %arg2: memref<32x8xf32, #tpu.memory_space<vmem>>, %arg3: memref<32x1xf32, #tpu.memory_space<vmem>>, %arg4: memref<32x32xf32, #tpu.memory_space<vmem>>, %arg5: memref<32x1xf32, #tpu.memory_space<vmem>>, %arg6: memref<32x32xf32, #tpu.memory_space<vmem>>, %arg7: memref<32x1xf32, #tpu.memory_space<vmem>>, %arg8: memref<16x32xf32, #tpu.memory_space<vmem>>, %arg9: memref<16x1xf32, #tpu.memory_space<vmem>>, %arg10: memref<16x128xf32, #tpu.memory_space<vmem>>) attributes {dimension_semantics = [#tpu.dimension_semantics<parallel>], iteration_bounds = array<i64: 3>, scalar_prefetch = 0 : i64, scratch_operands = 0 : i64, tpu.core_type = #tpu.core_type<tc>, window_params = [{transform_indices = @transform_0, window_bounds = array<i64: 8, 128>}, {pipeline_mode = #tpu.pipeline_mode<synchronous>, transform_indices = @transform_1, window_bounds = array<i64: 32, 8>}, {pipeline_mode = #tpu.pipeline_mode<synchronous>, transform_indices = @transform_2, window_bounds = array<i64: 32, 1>}, {pipeline_mode = #tpu.pipeline_mode<synchronous>, transform_indices = @transform_3, window_bounds = array<i64: 32, 32>}, {pipeline_mode = #tpu.pipeline_mode<synchronous>, transform_indices = @transform_4, window_bounds = array<i64: 32, 1>}, {pipeline_mode = #tpu.pipeline_mode<synchronous>, transform_indices = @transform_5, window_bounds = array<i64: 32, 32>}, {pipeline_mode = #tpu.pipeline_mode<synchronous>, transform_indices = @transform_6, window_bounds = array<i64: 32, 1>}, {pipeline_mode = #tpu.pipeline_mode<synchronous>, transform_indices = @transform_7, window_bounds = array<i64: 16, 32>}, {pipeline_mode = #tpu.pipeline_mode<synchronous>, transform_indices = @transform_8, window_bounds = array<i64: 16, 1>}, {transform_indices = @transform_9, window_bounds = array<i64: 16, 128>}]} {
    %c0 = arith.constant 0 : index
    %c0_0 = arith.constant 0 : index
    %0 = vector.load %arg1[%c0, %c0_0] : memref<8x128xf32, #tpu.memory_space<vmem>>, vector<8x128xf32>
    %c0_1 = arith.constant 0 : index
    %c0_2 = arith.constant 0 : index
    %1 = vector.load %arg2[%c0_1, %c0_2] : memref<32x8xf32, #tpu.memory_space<vmem>>, vector<32x8xf32>
    %cst = arith.constant dense<0.000000e+00> : vector<32x128xf32>
    %2 = tpu.matmul %1, %0, %cst {dimension_numbers = #tpu.dot_dimension_numbers<[1], [0], [0], [1], [0, 0, 1, 1], [], []>} : vector<32x8xf32>, vector<8x128xf32>, vector<32x128xf32> -> vector<32x128xf32>
    %c0_3 = arith.constant 0 : index
    %c0_4 = arith.constant 0 : index
    %3 = vector.load %arg3[%c0_3, %c0_4] : memref<32x1xf32, #tpu.memory_space<vmem>>, vector<32x1xf32>
    %4 = vector.broadcast %3 : vector<32x1xf32> to vector<32x128xf32>
    %5 = arith.addf %2, %4 : vector<32x128xf32>
    %6 = math.sin %5 : vector<32x128xf32>
    %c0_5 = arith.constant 0 : index
    %c0_6 = arith.constant 0 : index
    %7 = vector.load %arg4[%c0_5, %c0_6] : memref<32x32xf32, #tpu.memory_space<vmem>>, vector<32x32xf32>
    %cst_7 = arith.constant dense<0.000000e+00> : vector<32x128xf32>
    %8 = tpu.matmul %7, %6, %cst_7 {dimension_numbers = #tpu.dot_dimension_numbers<[1], [0], [0], [1], [0, 0, 1, 1], [], []>} : vector<32x32xf32>, vector<32x128xf32>, vector<32x128xf32> -> vector<32x128xf32>
    %c0_8 = arith.constant 0 : index
    %c0_9 = arith.constant 0 : index
    %9 = vector.load %arg5[%c0_8, %c0_9] : memref<32x1xf32, #tpu.memory_space<vmem>>, vector<32x1xf32>
    %10 = vector.broadcast %9 : vector<32x1xf32> to vector<32x128xf32>
    %11 = arith.addf %8, %10 : vector<32x128xf32>
    %12 = math.sin %11 : vector<32x128xf32>
    %c0_10 = arith.constant 0 : index
    %c0_11 = arith.constant 0 : index
    %13 = vector.load %arg6[%c0_10, %c0_11] : memref<32x32xf32, #tpu.memory_space<vmem>>, vector<32x32xf32>
    %cst_12 = arith.constant dense<0.000000e+00> : vector<32x128xf32>
    %14 = tpu.matmul %13, %12, %cst_12 {dimension_numbers = #tpu.dot_dimension_numbers<[1], [0], [0], [1], [0, 0, 1, 1], [], []>} : vector<32x32xf32>, vector<32x128xf32>, vector<32x128xf32> -> vector<32x128xf32>
    %c0_13 = arith.constant 0 : index
    %c0_14 = arith.constant 0 : index
    %15 = vector.load %arg7[%c0_13, %c0_14] : memref<32x1xf32, #tpu.memory_space<vmem>>, vector<32x1xf32>
    %16 = vector.broadcast %15 : vector<32x1xf32> to vector<32x128xf32>
    %17 = arith.addf %14, %16 : vector<32x128xf32>
    %18 = math.sin %17 : vector<32x128xf32>
    %c0_15 = arith.constant 0 : index
    %c0_16 = arith.constant 0 : index
    %19 = vector.load %arg8[%c0_15, %c0_16] : memref<16x32xf32, #tpu.memory_space<vmem>>, vector<16x32xf32>
    %cst_17 = arith.constant dense<0.000000e+00> : vector<16x128xf32>
    %20 = tpu.matmul %19, %18, %cst_17 {dimension_numbers = #tpu.dot_dimension_numbers<[1], [0], [0], [1], [0, 0, 1, 1], [], []>} : vector<16x32xf32>, vector<32x128xf32>, vector<16x128xf32> -> vector<16x128xf32>
    %c0_18 = arith.constant 0 : index
    %c0_19 = arith.constant 0 : index
    %21 = vector.load %arg9[%c0_18, %c0_19] : memref<16x1xf32, #tpu.memory_space<vmem>>, vector<16x1xf32>
    %22 = vector.broadcast %21 : vector<16x1xf32> to vector<16x128xf32>
    %23 = arith.addf %20, %22 : vector<16x128xf32>
    %c0_20 = arith.constant 0 : index
    %c0_21 = arith.constant 0 : index
    %24 = vector.load %arg10[%c0_20, %c0_21] : memref<16x128xf32, #tpu.memory_space<vmem>>, vector<16x128xf32>
    tpu.vector_store %arg10[%c0_20, %c0_21], %23 {strides = array<i32>} : memref<16x128xf32, #tpu.memory_space<vmem>>, vector<16x128xf32>,
    return
  }
  func.func @transform_0(%arg0: i32) -> (i32, i32) {
    %c0_i32 = arith.constant 0 : i32
    %c0_i32_0 = arith.constant 0 : i32
    return %c0_i32, %arg0 : i32, i32
  }
  func.func @transform_1(%arg0: i32) -> (i32, i32) {
    %c0_i32 = arith.constant 0 : i32
    %c0_i32_0 = arith.constant 0 : i32
    %c0_i32_1 = arith.constant 0 : i32
    return %c0_i32, %c0_i32_0 : i32, i32
  }
  func.func @transform_2(%arg0: i32) -> (i32, i32) {
    %c0_i32 = arith.constant 0 : i32
    %c0_i32_0 = arith.constant 0 : i32
    %c0_i32_1 = arith.constant 0 : i32
    return %c0_i32, %c0_i32_0 : i32, i32
  }
  func.func @transform_3(%arg0: i32) -> (i32, i32) {
    %c0_i32 = arith.constant 0 : i32
    %c0_i32_0 = arith.constant 0 : i32
    %c0_i32_1 = arith.constant 0 : i32
    return %c0_i32, %c0_i32_0 : i32, i32
  }
  func.func @transform_4(%arg0: i32) -> (i32, i32) {
    %c0_i32 = arith.constant 0 : i32
    %c0_i32_0 = arith.constant 0 : i32
    %c0_i32_1 = arith.constant 0 : i32
    return %c0_i32, %c0_i32_0 : i32, i32
  }
  func.func @transform_5(%arg0: i32) -> (i32, i32) {
    %c0_i32 = arith.constant 0 : i32
    %c0_i32_0 = arith.constant 0 : i32
    %c0_i32_1 = arith.constant 0 : i32
    return %c0_i32, %c0_i32_0 : i32, i32
  }
  func.func @transform_6(%arg0: i32) -> (i32, i32) {
    %c0_i32 = arith.constant 0 : i32
    %c0_i32_0 = arith.constant 0 : i32
    %c0_i32_1 = arith.constant 0 : i32
    return %c0_i32, %c0_i32_0 : i32, i32
  }
  func.func @transform_7(%arg0: i32) -> (i32, i32) {
    %c0_i32 = arith.constant 0 : i32
    %c0_i32_0 = arith.constant 0 : i32
    %c0_i32_1 = arith.constant 0 : i32
    return %c0_i32, %c0_i32_0 : i32, i32
  }
  func.func @transform_8(%arg0: i32) -> (i32, i32) {
    %c0_i32 = arith.constant 0 : i32
    %c0_i32_0 = arith.constant 0 : i32
    %c0_i32_1 = arith.constant 0 : i32
    return %c0_i32, %c0_i32_0 : i32, i32
  }
  func.func @transform_9(%arg0: i32) -> (i32, i32) {
    %c0_i32 = arith.constant 0 : i32
    %c0_i32_0 = arith.constant 0 : i32
    return %c0_i32, %arg0 : i32, i32
  }
}

</mosaic_0001>

<bundles_post_ra>
// kernel: tpu_custom_call.1
= control target key start
LH: loop header
LB: loop body
LE: loop exit
PB: predicated region body
PF: predicated region fallthrough
CT: control target
= control target key end

     0   :  { %14 = vsyncpa [#allocation3], 0  ;;  %s3640_s0 = inlined_call_operand.vmem [shape: f32[8,384], index: 0, kind: input, shape index: {}]   ;;  %s3641_s1 = inlined_call_operand.vmem [shape: f32[32,8], index: 1, kind: input, shape index: {}]   ;;  %s3642_s2 = inlined_call_operand.vmem [shape: f32[32,1], index: 2, kind: input, shape index: {}]   ;;  %s3643_s3 = inlined_call_operand.vmem [shape: f32[32,32], index: 3, kind: input, shape index: {}]   ;;  %s3644_s4 = inlined_call_operand.vmem [shape: f32[32,1], index: 4, kind: input, shape index: {}]   ;;  %s3645_s5 = inlined_call_operand.vmem [shape: f32[32,32], index: 5, kind: input, shape index: {}]   ;;  %s3646_s6 = inlined_call_operand.vmem [shape: f32[32,1], index: 6, kind: input, shape index: {}]   ;;  %s3647_s7 = inlined_call_operand.vmem [shape: f32[16,32], index: 7, kind: input, shape index: {}]   ;;  %s3648_s8 = inlined_call_operand.vmem [shape: f32[16,1], index: 8, kind: input, shape index: {}]   ;;  %s3649_s9 = inlined_call_operand.hbm [shape: f32[16,384], index: 9, kind: output, shape index: {}]  }
   0x1   :  { %16 = vsyncpa [#allocation3 + $0x1], 0  ;;  %s2568_s30 = smov 0   ;;  %s2570_s10 = smov 0  }
   0x2   :  { %s2572_s11 = smov 0   ;;  %s2574_s12 = smov 0  }
   0x3 LB: > { %s2589_s13 = sadd.s32 4294967295, %s2505_s12   ;;  %s2126_s14 = sadd.s32 4294967294, %s2505_s12   ;;  %s2505_s12 = sphi %s2574_s12, %s3675_s12   ;;  %s2501_s11 = sphi %s2572_s11, %s3674_s11   ;;  %s2497_s10 = sphi %s2570_s10, %s3673_s10   ;;  %s2493_s30 = sphi %s2568_s30, %s3672_s30  }
   0x4   : > { %s2593_s15 = sadd.s32 1, %s2505_s12   ;;  %s223_s16 = sadd.s32 1, %s2501_s11 }
   0x5   : > { %s220_s17 = ssub.s32 %s2505_s12, %s2593_s15  ;;  %p233_p0 = scmp.ne.s32.totalorder %s2501_s11, %s2497_s10 }
   0x6   : > { %p221_p1 = scmp.eq.s32.totalorder %s220_s17, 0  ;;  %p234_p2 = scmp.eq.s32.totalorder %s2589_s13, 2 }
   0x7   : > { %p239_p3 = scmp.ne.s32.totalorder %s2497_s10, %s2493_s30  ;;  %p240_p4 = scmp.eq.s32.totalorder %s2126_s14, 2 }
   0x8   : > { %s2604_s18 = scalar_select %p221_p1, %s2501_s11, %s223_s16  }
   0x9   : > { %p2606_p5 = por %p234_p2, %p233_p0  ;;  %p2610_p6 = por %p240_p4, %p239_p3 }
   0xa   : > { %3650 = sst [smem:[#allocation5_spill]] %s2604_s18  ;;  %p2129_p7 = scmp.ge.s32.totalorder %s2505_s12, 1 }
   0xb   : > { %p289_p8 = scmp.lt.s32.totalorder %s2505_s12, 4 }
   0xd   : > { %p290_p9 = pnand %p2129_p7, %p289_p8 }
   0xe   : > { %p324_p10 = scmp.lt.s32.totalorder (!%p290_p9), %s2589_s13, 2  ;;  %v329_v0 = vld [vmem:[%s3641_s1] sm:$0xff] (!%p290_p9)  ;;  %vm357_vm0 = vcmask (!%p290_p9), 64512   ;;  %v2507_v1 = vmov (!%p290_p9), 0   ;;  %v335_v3 = vld [vmem:[%s3642_s2 + $0x10] sm:$0xff] (!%p290_p9)  ;;  %v334_v4 = vld [vmem:[%s3642_s2 + $0x8] sm:$0xff] (!%p290_p9) }
   0xf   : > { %293 = sbr.rel (%p290_p9) target bundleno = 1312 (0x520), region = 56  ;;  %2227 = vmatprep.mubr.msk.f32.mxu0 (!%p290_p9), %vm357_vm0, %v329_v0  ;;  %2393 = vset.pattern.permute.xlu0 (!%p290_p9), %v2507_v1  ;;  %v333_v2 = vld [vmem:[%s3642_s2] sm:$0xff] (!%p290_p9)  ;;  %v336_v5 = vld [vmem:[%s3642_s2 + $0x18] sm:$0xff] (!%p290_p9)  ;;  %v330_v7 = vld [vmem:[%s3641_s1 + $0x8] sm:$0xff] (!%p290_p9)  ;;  %v2508_v63 = vmov (!%p290_p9), 683565275  }
  0x10   : > { %339 = vperm.xlu0 (!%p290_p9), %2393, %v333_v2   ;;  %2394 = vset.pattern.permute.xlu1 (!%p290_p9), %v2507_v1  ;;  %v331_v8 = vld [vmem:[%s3641_s1 + $0x10] sm:$0xff] (!%p290_p9)  ;;  %v875_v9 = vld [vmem:[%s3644_s4] sm:$0xff] (!%p290_p9)  ;;  %v876_v10 = vld [vmem:[%s3644_s4 + $0x8] sm:$0xff] (!%p290_p9)  ;;  %v2509_v1 = vmov (!%p290_p9), 2475754826   ;;  %vm899_vm13 = vcmask (!%p290_p9), 261120  }
  0x11   : > { %349 = vperm.xlu1 (!%p290_p9), %2394, %v335_v3   ;;  %v332_v11 = vld [vmem:[%s3641_s1 + $0x18] sm:$0xff] (!%p290_p9)  ;;  %v877_v12 = vld [vmem:[%s3644_s4 + $0x10] sm:$0xff] (!%p290_p9)  ;;  %v1417_v14 = vld [vmem:[%s3646_s6] sm:$0xff] (!%p290_p9)  ;;  %s321_s16 = sand.u32 (!%p290_p9), 1, %s2497_s10   ;;  %s2195_s21 = sshll.u32 (!%p290_p9), %s2589_s13, 7 }
  0x12   : > { %v878_v13 = vld [vmem:[%s3644_s4 + $0x18] sm:$0xff] (!%p290_p9)  ;;  %v1418_v15 = vld [vmem:[%s3646_s6 + $0x8] sm:$0xff] (!%p290_p9)  ;;  %v1419_v16 = vld [vmem:[%s3646_s6 + $0x10] sm:$0xff] (!%p290_p9)  ;;  %s3597_s24 = scalar_lea.hbm (!%p290_p9), %s3649_s9, %s2195_s21  ;;  %s3599_s25 = scalar_lea.sflag (!%p290_p9), [#allocation3], %s321_s16 }
  0x13   : > { %v1420_v17 = vld [vmem:[%s3646_s6 + $0x18] sm:$0xff] (!%p290_p9)  ;;  %v1956_v18 = vld [vmem:[%s3648_s8] sm:$0xff] (!%p290_p9)  ;;  %v1957_v19 = vld [vmem:[%s3648_s8 + $0x8] sm:$0xff] (!%p290_p9)  ;;  %s2514_s26 = smov (!%p290_p9), [#allocation2]  }
  0x14   : > { %344 = vperm.xlu0 (!%p290_p9), %2393, %v334_v4   ;;  %v2510_v4 = vmov (!%p290_p9), 2131351028  }
  0x15   : > { %354 = vperm.xlu1 (!%p290_p9), %2394, %v336_v5  }
  0x16   : > { %s325_s27 = scalar_select %p324_p10, %s2589_s13, 2 }
  0x18   : > { %s2131_s14 = sshll.u32 %s325_s27, 3  ;;  %881 = vperm.xlu0 %2393, %v875_v9   ;;  %s2447_s27 = sshll.u32 %s2514_s26, 4  ;;  %s2448_s27 = int_to_ptr.vmem [resolvable:$false] %s2447_s27 }
  0x19   : > { %s327_s23 = scalar_lea.vmem %s3640_s0, %s2131_s14  ;;  %886 = vperm.xlu1 %2394, %v876_v10   ;;  %s2130_s14 = sshll.u32 %s321_s16, 4 }
  0x1a   : > { %v328_v6 = vld [vmem:[%s327_s23] sm:$0xff]  ;;  %s323_s17 = scalar_lea.vmem [#allocation2], %s2130_s14  ;;  %s2449_s28 = scalar_lea.vmem %s2448_s27, 512 }
  0x1b   : > { %2225 = vmatprep.subr.mxu0 %v328_v6  ;;  %s2064_s18 = sshll.u32 %s323_s17, 4  ;;  %s3592_s18 = int_to_ptr.vmem [resolvable:$true] %s2064_s18 }
  0x1c   : > { %2226 = vmatpush3.msra.mxu0 %v328_v6  ;;  %891 = vperm.xlu0 %2393, %v877_v12   ;;  %v2511_v6 = vmov 2102212464   ;;  %s2443_s13 = scalar_lea.vmem %s3592_s18, 256  ;;  %p2450_p0 = scmp.lt.s32.totalorder %s3592_s18, %s2448_s27 }
  0x1d   : > { %2228 = vmatmul.mubr.msk.f32.vlgmr.msra.gmra.mrb[0].mxu0 %vm357_vm0, %v330_v7  ;;  %896 = vperm.xlu1 %2394, %v878_v13   ;;  %p2444_p11 = scmp.ne.s32.totalorder %s3592_s18, %s2443_s13  ;;  %p2451_p1 = scmp.lt.s32.totalorder %s2449_s28, %s2443_s13 }
  0x1e   : > { %2230 = vmatprep.mubr.msk.f32.mxu0 %vm357_vm0, %v331_v8  ;;  %v2512_v8 = vmov 920167782  }
  0x1f   : > { %p2445_p12 = pnand %p2444_p11, %p2606_p5  ;;  %p2452_p2 = por %p2451_p1, %p2450_p0 }
  0x20   : > { %1423 = vperm.xlu0 %2393, %v1417_v14  }
  0x21   : > { %2231 = vmatmul.mubr.msk.f32.gmra.mrb[2].mxu0 %vm357_vm0, %v332_v11  ;;  %1428 = vperm.xlu1 %2394, %v1418_v15   ;;  %v2513_v15 = vmov 1326507024   ;;  %p2446_p13 = pneg %p2445_p12 }
  0x23   : > { %p2453_p3 = pnand %p2452_p2, %p2446_p13 }
  0x24   : > { %1433 = vperm.xlu0 %2393, %v1419_v16  }
  0x25   : > { %1438 = vperm.xlu1 %2394, %v1420_v17  }
  0x28   : > { %1960 = vperm.xlu0 %2393, %v1956_v18  }
  0x29   : > { %1965 = vperm.xlu1 %2394, %v1957_v19  }
  0x8f   : > { %v340_v20 = vpop.permute.xlu0 %339 }
  0x90   : > { %v350_v21 = vpop.permute.xlu1 %349 }
  0x93   : > { %v345_v22 = vpop.permute.xlu0 %344 }
  0x94   : > { %v355_v29 = vpop.permute.xlu1 %354 }
  0xf0   : > { %v2229_v23 = vpop.f32.mrb[0].mxu0 }
  0xf1   : > { %v2679_v24 = vadd.f32 %v2229_v23, %v345_v22  ;;  %v436_v25 = vpop.f32.mrb[1].mxu0 }
  0xf2   : > { %v2681_v26 = vadd.f32 %v436_v25, %v340_v20 }
  0xf3   : > { %v559_v27 = vand.u32 2147483647, %v2679_v24  ;;  %v562_v28 = vand.u32 2139095040, %v2679_v24 }
  0xf4   : > { %v455_v30 = vand.u32 2147483647, %v2681_v26  ;;  %v458_v31 = vand.u32 2139095040, %v2681_v26  ;;  %v2232_v32 = vpop.f32.mrb[2].mxu0 }
  0xf5   : > { %v563_v33 = vshrl.u32 %v562_v28, 23  ;;  %v566_v34 = vand.u32 8388607, %v559_v27  ;;  %v2689_v35 = vadd.f32 %v2232_v32, %v355_v29  ;;  %v446_v36 = vpop.f32.mrb[3].mxu0 }
  0xf6   : > { %v459_v37 = vshrl.u32 %v458_v31, 23  ;;  %v462_v38 = vand.u32 8388607, %v455_v30  ;;  %v2694_v41 = vadd.f32 %v446_v36, %v350_v21 }
  0xf7   : > { %v2140_v39 = vadd.s32 4294967169, %v563_v33  ;;  %v767_v40 = vand.u32 2147483647, %v2689_v35  ;;  %v567_v42 = vor.u32 8388608, %v566_v34  ;;  %v770_v44 = vand.u32 2139095040, %v2689_v35 }
  0xf8   : > { %v2136_v43 = vadd.s32 4294967169, %v459_v37  ;;  %v463_v46 = vor.u32 8388608, %v462_v38  ;;  %v663_v50 = vand.u32 2147483647, %v2694_v41  ;;  %v666_v61 = vand.u32 2139095040, %v2694_v41 }
  0xf9   : > { %v569_v45 = vadd.s32 1, %v2140_v39  ;;  %v771_v48 = vshrl.u32 %v770_v44, 23  ;;  %v2699_v49 = vand.u32 8388607, %v767_v40  ;;  %v2702_v52 = vshll.u32 %v567_v42, 8 }
  0xfa   : > { %v465_v47 = vadd.s32 1, %v2136_v43  ;;  %v2704_v57 = vshll.u32 %v463_v46, 8 }
  0xfb   : > { %vm570_vm1 = vcmp.gt.s32.totalorder %v569_v45, 0  ;;  %v2148_v53 = vadd.s32 4294967169, %v771_v48  ;;  %v775_v60 = vor.u32 8388608, %v2699_v49 }
  0xfc   : > { %v571_v51 = vsel %vm570_vm1, %v569_v45, 0  ;;  %vm466_vm2 = vcmp.gt.s32.totalorder %v465_v47, 0 }
  0xfd   : > { %v572_v54 = vshrl.u32 %v571_v51, 5  ;;  %v573_v55 = vand.u32 31, %v571_v51  ;;  %v467_v56 = vsel %vm466_vm2, %v465_v47, 0  ;;  %v2712_v3 = vadd.s32 1, %v2148_v53 }
  0xfe   : > { %v2706_v58 = vshrl.u32 %v467_v56, 5  ;;  %v469_v59 = vand.u32 31, %v467_v56 }
  0xff   : > { %v574_v62 = vsub.s32 32, %v573_v55  ;;  %v576_v0 = vshll.u32 %v2508_v63, %v573_v55  ;;  %v579_v2 = vshll.u32 %v2509_v1, %v573_v55  ;;  %v582_v5 = vshll.u32 %v2510_v4, %v573_v55 }
 0x100   : > { %v585_v7 = vshll.u32 %v2511_v6, %v573_v55  ;;  %v588_v9 = vshll.u32 %v2512_v8, %v573_v55  ;;  %vm591_vm3 = vcmp.lt.s32.totalorder %v572_v54, 1  ;;  %vm592_vm4 = vcmp.lt.s32.totalorder %v572_v54, 2 }
 0x101   : > { %v577_v10 = vshrl.u32 %v2509_v1, %v574_v62  ;;  %v580_v11 = vshrl.u32 %v2510_v4, %v574_v62  ;;  %v583_v12 = vshrl.u32 %v2511_v6, %v574_v62  ;;  %v575_v13 = vshrl.u32 %v2508_v63, %v574_v62 }
 0x102   : > { %v586_v14 = vshrl.u32 %v2512_v8, %v574_v62  ;;  %v589_v16 = vshrl.u32 %v2513_v15, %v574_v62  ;;  %vm593_vm5 = vcmp.lt.s32.totalorder %v572_v54, 3  ;;  %v470_v20 = vsub.s32 32, %v469_v59 }
 0x103   : > { %v578_v17 = vor.u32 %v577_v10, %v576_v0  ;;  %v581_v18 = vor.u32 %v580_v11, %v579_v2  ;;  %v584_v19 = vor.u32 %v583_v12, %v582_v5  ;;  %vm594_vm6 = vcmp.lt.s32.totalorder %v572_v54, 4 }
 0x104   : > { %v587_v21 = vor.u32 %v586_v14, %v585_v7  ;;  %v590_v22 = vor.u32 %v589_v16, %v588_v9  ;;  %v472_v23 = vshll.u32 %v2508_v63, %v469_v59  ;;  %v475_v36 = vshll.u32 %v2509_v1, %v469_v59 }
 0x105   : > { %v595_v25 = vsel %vm591_vm3, %v575_v13, %v578_v17  ;;  %v596_v28 = vsel %vm594_vm6, %v584_v19, 2102212464  ;;  %v599_v29 = vsel %vm591_vm3, %v578_v17, %v581_v18  ;;  %v603_v31 = vsel %vm591_vm3, %v581_v18, %v584_v19 }
 0x106   : > { %v597_v32 = vsel %vm593_vm5, %v581_v18, %v596_v28  ;;  %v600_v33 = vsel %vm594_vm6, %v587_v21, 920167782  ;;  %v604_v34 = vsel %vm594_vm6, %v590_v22, 1326507024  ;;  %v471_v39 = vshrl.u32 %v2508_v63, %v470_v20 }
 0x107   : > { %v601_v37 = vsel %vm593_vm5, %v584_v19, %v600_v33  ;;  %v605_v38 = vsel %vm593_vm5, %v587_v21, %v604_v34  ;;  %v473_v42 = vshrl.u32 %v2509_v1, %v470_v20  ;;  %v598_v43 = vsel %vm592_vm4, %v595_v25, %v597_v32 }
 0x108   : > { %v602_v44 = vsel %vm592_vm4, %v599_v29, %v601_v37  ;;  %v606_v45 = vsel %vm592_vm4, %v603_v31, %v605_v38  ;;  %v476_v46 = vshrl.u32 %v2510_v4, %v470_v20  ;;  %v478_v62 = vshll.u32 %v2510_v4, %v469_v59 }
 0x109   : > { %v2738_v47 = vmul.u32.u64.low %v2702_v52, %v606_v45  ;;  %v2739_v48 = vmul.u32.u64.high %v2702_v52, %v606_v45, %v2738_v47  ;;  %v2742_v51 = vmul.u32.u64.low %v2702_v52, %v602_v44  ;;  %v2743_v53 = vmul.u32.u64.high %v2702_v52, %v602_v44, %v2742_v51 }
 0x10a   : > { %v474_v55 = vor.u32 %v473_v42, %v472_v23  ;;  %v477_v56 = vor.u32 %v476_v46, %v475_v36  ;;  %v479_v0 = vshrl.u32 %v2511_v6, %v470_v20  ;;  %v614_v54 = vmul.u32 %v2702_v52, %v598_v43 }
 0x10b   : > { %v481_v2 = vshll.u32 %v2511_v6, %v469_v59  ;;  %v482_v5 = vshrl.u32 %v2512_v8, %v470_v20  ;;  %v485_v7 = vshrl.u32 %v2513_v15, %v470_v20  ;;  %v484_v10 = vshll.u32 %v2512_v8, %v469_v59 }
 0x10c   : > { %v480_v9 = vor.u32 %v479_v0, %v478_v62  ;;  %vm487_vm7 = vcmp.lt.s32.totalorder %v2706_v58, 1  ;;  %vm488_vm8 = vcmp.lt.s32.totalorder %v2706_v58, 2  ;;  %vm616_vm9 = vc.u32 %v2739_v48, %v2742_v51 }
 0x10d   : > { %v617_v11 = vadd.s32 1, %v2743_v53  ;;  %v483_v12 = vor.u32 %v482_v5, %v481_v2  ;;  %vm489_vm10 = vcmp.lt.s32.totalorder %v2706_v58, 3  ;;  %v486_v52 = vor.u32 %v485_v7, %v484_v10 }
 0x10e   : > { %vm490_vm11 = vcmp.lt.s32.totalorder %v2706_v58, 4  ;;  %v491_v13 = vsel %vm487_vm7, %v471_v39, %v474_v55  ;;  %v495_v14 = vsel %vm487_vm7, %v474_v55, %v477_v56  ;;  %v499_v18 = vsel %vm487_vm7, %v477_v56, %v480_v9  ;;  %v871_v39 = vld [vmem:[%s3643_s3] sm:$0xff] }
 0x10f   : > { %v618_v16 = vsel %vm616_vm9, %v617_v11, %v2743_v53  ;;  %v492_v59 = vsel %vm490_vm11, %v480_v9, 2102212464  ;;  %v496_v17 = vsel %vm490_vm11, %v483_v12, 920167782  ;;  %v500_v22 = vsel %vm490_vm11, %v486_v52, 1326507024  ;;  %2241 = vmatprep.mubr.msk.f32.mxu1 %vm899_vm13, %v871_v39 }
 0x110   : > { %v619_v19 = vadd.s32 %v618_v16, %v614_v54  ;;  %v493_v20 = vsel %vm489_vm10, %v477_v56, %v492_v59  ;;  %v497_v21 = vsel %vm489_vm10, %v480_v9, %v496_v17  ;;  %v501_v28 = vsel %vm489_vm10, %v483_v12, %v500_v22 }
 0x111   : > { %v494_v23 = vsel %vm488_vm8, %v491_v13, %v493_v20  ;;  %v498_v25 = vsel %vm488_vm8, %v495_v14, %v497_v21  ;;  %vm778_vm12 = vcmp.gt.s32.totalorder %v2712_v3, 0  ;;  %v502_v31 = vsel %vm488_vm8, %v499_v18, %v501_v28 }
 0x112   : > { %v620_v29 = vadd.s32 536870912, %v619_v19  ;;  %v2769_v32 = vmul.u32.u64.low %v2704_v57, %v498_v25  ;;  %v2770_v33 = vmul.u32.u64.high %v2704_v57, %v498_v25, %v2769_v32  ;;  %v779_v37 = vsel %vm778_vm12, %v2712_v3, 0 }
 0x113   : > { %v2774_v34 = vmul.u32.u64.low %v2704_v57, %v502_v31  ;;  %v2775_v36 = vmul.u32.u64.high %v2704_v57, %v502_v31, %v2774_v34  ;;  %v667_v38 = vshrl.u32 %v666_v61, 23  ;;  %v781_v42 = vand.u32 31, %v779_v37 }
 0x114   : > { %v2783_v58 = vshrl.u32 %v620_v29, 30  ;;  %v510_v43 = vmul.u32 %v2704_v57, %v494_v23  ;;  %v2788_v44 = vshll.u32 %v775_v60, 8  ;;  %v2792_v45 = vand.u32 8388607, %v663_v50 }
 0x115   : > { %v513_v3 = vadd.s32 1, %v2770_v33  ;;  %v780_v46 = vshrl.u32 %v779_v37, 5  ;;  %v782_v47 = vsub.s32 32, %v781_v42  ;;  %vm512_vm14 = vc.u32 %v2775_v36, %v2769_v32 }
 0x116   : > { %v622_v61 = vshll.u32 %v2783_v58, 30  ;;  %v784_v49 = vshll.u32 %v2508_v63, %v781_v42  ;;  %v787_v57 = vshll.u32 %v2509_v1, %v781_v42  ;;  %v2144_v60 = vadd.s32 4294967169, %v667_v38 }
 0x117   : > { %v514_v55 = vsel %vm512_vm14, %v513_v3, %v2770_v33  ;;  %v785_v56 = vshrl.u32 %v2509_v1, %v782_v47  ;;  %v790_v62 = vshll.u32 %v2510_v4, %v781_v42  ;;  %v788_v54 = vshrl.u32 %v2510_v4, %v782_v47 }
 0x118   : > { %v2801_v53 = vsub.s32 %v619_v19, %v622_v61  ;;  %v515_v0 = vadd.s32 %v514_v55, %v510_v43  ;;  %v791_v2 = vshrl.u32 %v2511_v6, %v782_v47  ;;  %v793_v5 = vshll.u32 %v2511_v6, %v781_v42 }
 0x119   : > { %v786_v9 = vor.u32 %v785_v56, %v784_v49  ;;  %v794_v10 = vshrl.u32 %v2512_v8, %v782_v47  ;;  %v796_v11 = vshll.u32 %v2512_v8, %v781_v42  ;;  %v789_v52 = vor.u32 %v788_v54, %v787_v57 }
 0x11a   : > { %v625_v7 = vsub.s32 0, %v2801_v53  ;;  %v516_v12 = vadd.s32 536870912, %v515_v0  ;;  %v792_v13 = vor.u32 %v791_v2, %v790_v62  ;;  %v797_v14 = vshrl.u32 %v2513_v15, %v782_v47 }
 0x11b   : > { %v783_v59 = vshrl.u32 %v2508_v63, %v782_v47  ;;  %v795_v17 = vor.u32 %v794_v10, %v793_v5  ;;  %vm799_vm15 = vcmp.lt.s32.totalorder %v780_v46, 1  ;;  %vm801_vm0 = vcmp.lt.s32.totalorder %v780_v46, 3 }
 0x11c   : > { %v2141_v16 = vmin.u32 %v625_v7, %v2801_v53  ;;  %v517_v18 = vshrl.u32 %v516_v12, 30  ;;  %v798_v19 = vor.u32 %v797_v14, %v796_v11  ;;  %vm802_vm1 = vcmp.lt.s32.totalorder %v780_v46, 4 }
 0x11d   : > { %v803_v21 = vsel %vm799_vm15, %v783_v59, %v786_v9  ;;  %v804_v22 = vsel %vm802_vm1, %v792_v13, 2102212464  ;;  %v807_v23 = vsel %vm799_vm15, %v786_v9, %v789_v52  ;;  %v808_v29 = vsel %vm802_vm1, %v795_v17, 920167782 }
 0x11e   : > { %v627_v20 = vclz %v2141_v16  ;;  %v518_v25 = vshll.u32 %v517_v18, 30  ;;  %v805_v28 = vsel %vm801_vm0, %v789_v52, %v804_v22  ;;  %v811_v31 = vsel %vm799_vm15, %v789_v52, %v792_v13 }
 0x11f   : > { %vm800_vm2 = vcmp.lt.s32.totalorder %v780_v46, 2  ;;  %v809_v34 = vsel %vm801_vm0, %v792_v13, %v808_v29  ;;  %v812_v37 = vsel %vm802_vm1, %v798_v19, 1326507024  ;;  %v615_v62 = vadd.s32 %v2742_v51, %v2739_v48 }
 0x120   : > { %v2142_v33 = vadd.s32 4294967294, %v627_v20  ;;  %v2817_v38 = vsub.s32 %v515_v0, %v518_v25  ;;  %v806_v39 = vsel %vm800_vm2, %v803_v21, %v805_v28  ;;  %v810_v42 = vsel %vm800_vm2, %v807_v23, %v809_v34 }
 0x121   : > { %v813_v43 = vsel %vm801_vm0, %v795_v17, %v812_v37  ;;  %v2821_v3 = vmul.u32.u64.low %v2788_v44, %v810_v42  ;;  %v2822_v47 = vmul.u32.u64.high %v2788_v44, %v810_v42, %v2821_v3  ;;  %v673_v54 = vadd.s32 1, %v2144_v60 }
 0x122   : > { %vm2143_vm3 = vcmp.lt.s32.totalorder %v2142_v33, 0  ;;  %v814_v61 = vsel %vm800_vm2, %v811_v31, %v813_v43  ;;  %v521_v57 = vsub.s32 0, %v2817_v38  ;;  %v822_v7 = vmul.u32 %v2788_v44, %v806_v39 }
 0x123   : > { %v630_v49 = vsel %vm2143_vm3, 0, %v2142_v33  ;;  %v2827_v55 = vmul.u32.u64.low %v2788_v44, %v814_v61  ;;  %v2828_v56 = vmul.u32.u64.high %v2788_v44, %v814_v61, %v2827_v55  ;;  %v671_v9 = vor.u32 8388608, %v2792_v45 }
 0x124   : > { %v631_v0 = vsub.s32 32, %v630_v49  ;;  %v635_v46 = vsub.s32 4294967266, %v630_v49  ;;  %v632_v2 = vshll.u32 %v2801_v53, %v630_v49  ;;  %v2137_v5 = vmin.u32 %v521_v57, %v2817_v38 }
 0x125   : > { %v825_v12 = vadd.s32 1, %v2822_v47  ;;  %vm674_vm4 = vcmp.gt.s32.totalorder %v673_v54, 0  ;;  %vm824_vm5 = vc.u32 %v2828_v56, %v2821_v3  ;;  %v541_v51 = vsub.s32 4, %v517_v18 }
 0x126   : > { %v633_v10 = vshrl.u32 %v615_v62, %v631_v0  ;;  %v636_v11 = vadd.s32 127, %v635_v46  ;;  %v523_v52 = vclz %v2137_v5  ;;  %v675_v48 = vsel %vm674_vm4, %v673_v54, 0 }
 0x127   : > { %vm457_vm6 = vcmp.lt.s32.totalorder %v2681_v26, 0  ;;  %v826_v53 = vsel %vm824_vm5, %v825_v12, %v2822_v47  ;;  %v511_v44 = vadd.s32 %v2769_v32, %v2775_v36  ;;  %v677_v16 = vand.u32 31, %v675_v48 }
 0x128   : > { %v634_v60 = vor.u32 %v633_v10, %v632_v2  ;;  %v637_v13 = vshll.u32 %v636_v11, 23  ;;  %v2138_v45 = vadd.s32 4294967294, %v523_v52  ;;  %v827_v14 = vadd.s32 %v826_v53, %v822_v7 }
 0x129   : > { %v2843_v17 = vshrl.u32 %v675_v48, 5  ;;  %v2845_v19 = vshll.u32 %v671_v9, 8  ;;  %v645_v20 = vsub.s32 4, %v2783_v58  ;;  %v678_v22 = vsub.s32 32, %v677_v16 }
 0x12a   : > { %v638_v59 = vor.u32 4788187, %v637_v13  ;;  %vm2139_vm7 = vcmp.lt.s32.totalorder %v2138_v45, 0  ;;  %v828_v21 = vadd.s32 536870912, %v827_v14  ;;  %v2850_v23 = vsel %vm457_vm6, %v541_v51, %v517_v18 }
 0x12b   : > { %v641_v28 = vcvt.s32.f32 %v634_v60  ;;  %v526_v32 = vsel %vm2139_vm7, 0, %v2138_v45  ;;  %v680_v36 = vshll.u32 %v2508_v63, %v677_v16  ;;  %v683_v34 = vshll.u32 %v2509_v1, %v677_v16 }
 0x12c   : > { %v639_v25 = vand.u32 2147483647, %v638_v59  ;;  %v527_v29 = vsub.s32 32, %v526_v32  ;;  %v531_v31 = vsub.s32 4294967266, %v526_v32  ;;  %v2853_v33 = vshrl.u32 %v828_v21, 30 }
 0x12d   : > { %v528_v39 = vshll.u32 %v2817_v38, %v526_v32  ;;  %v681_v42 = vshrl.u32 %v2509_v1, %v678_v22  ;;  %v684_v43 = vshrl.u32 %v2510_v4, %v678_v22  ;;  %vm561_vm8 = vcmp.lt.s32.totalorder %v2679_v24, 0 }
 0x12e   : > { %v642_v37 = vmul.f32 %v641_v28, %v639_v25  ;;  %v529_v18 = vshrl.u32 %v511_v44, %v527_v29  ;;  %v532_v61 = vadd.s32 127, %v531_v31  ;;  %v830_v47 = vshll.u32 %v2853_v33, 30 }
 0x12f   : > { %v687_v49 = vshrl.u32 %v2511_v6, %v678_v22  ;;  %v682_v57 = vor.u32 %v681_v42, %v680_v36  ;;  %v685_v55 = vor.u32 %v684_v43, %v683_v34  ;;  %v686_v62 = vshll.u32 %v2510_v4, %v677_v16 }
 0x130   : > { %vm695_vm9 = vcmp.lt.s32.totalorder %v2843_v17, 1  ;;  %v530_v0 = vor.u32 %v529_v18, %v528_v39  ;;  %v533_v38 = vshll.u32 %v532_v61, 23  ;;  %v2864_v46 = vsub.s32 %v827_v14, %v830_v47 }
 0x131   : > { %v689_v54 = vshll.u32 %v2511_v6, %v677_v16  ;;  %v688_v2 = vor.u32 %v687_v49, %v686_v62  ;;  %v690_v5 = vshrl.u32 %v2512_v8, %v678_v22  ;;  %v692_v7 = vshll.u32 %v2512_v8, %v677_v16 }
 0x132   : > { %v693_v9 = vshrl.u32 %v2513_v15, %v678_v22  ;;  %v643_v10 = vxor.u32 2147483648, %v642_v37  ;;  %v534_v11 = vor.u32 4788187, %v533_v38  ;;  %v833_v12 = vsub.s32 0, %v2864_v46 }
 0x133   : > { %v679_v52 = vshrl.u32 %v2508_v63, %v678_v22  ;;  %v537_v48 = vcvt.s32.f32 %v530_v0  ;;  %v691_v51 = vor.u32 %v690_v5, %v689_v54  ;;  %vm697_vm10 = vcmp.lt.s32.totalorder %v2843_v17, 3 }
 0x134   : > { %v694_v60 = vor.u32 %v693_v9, %v692_v7  ;;  %v535_v13 = vand.u32 2147483647, %v534_v11  ;;  %v2149_v53 = vmin.u32 %v833_v12, %v2864_v46  ;;  %vm698_vm11 = vcmp.lt.s32.totalorder %v2843_v17, 4 }
 0x135   : > { %v703_v44 = vsel %vm695_vm9, %v682_v57, %v685_v55  ;;  %v700_v45 = vsel %vm698_vm11, %v688_v2, 2102212464  ;;  %v704_v14 = vsel %vm698_vm11, %v691_v51, 920167782  ;;  %v707_v16 = vsel %vm695_vm9, %v685_v55, %v688_v2 }
 0x136   : > { %v708_v59 = vsel %vm698_vm11, %v694_v60, 1326507024  ;;  %v538_v21 = vmul.f32 %v537_v48, %v535_v13  ;;  %v835_v22 = vclz %v2149_v53  ;;  %vm696_vm12 = vcmp.lt.s32.totalorder %v2843_v17, 2 }
 0x137   : > { %v705_v25 = vsel %vm697_vm10, %v688_v2, %v704_v14  ;;  %v644_v28 = vsel %vm561_vm8, %v643_v10, %v642_v37  ;;  %v699_v32 = vsel %vm695_vm9, %v679_v52, %v682_v57  ;;  %v709_v29 = vsel %vm697_vm10, %v691_v51, %v708_v59 }
 0x138   : > { %v706_v36 = vsel %vm696_vm12, %v703_v44, %v705_v25  ;;  %v539_v31 = vxor.u32 2147483648, %v538_v21  ;;  %v2150_v34 = vadd.s32 4294967294, %v835_v22  ;;  %v701_v39 = vsel %vm697_vm10, %v685_v55, %v700_v45 }
 0x139   : > { %v710_v42 = vsel %vm696_vm12, %v707_v16, %v709_v29  ;;  %v2899_v18 = vmul.u32.u64.low %v2845_v19, %v706_v36  ;;  %v2900_v61 = vmul.u32.u64.high %v2845_v19, %v706_v36, %v2899_v18  ;;  %vm2907_vm15 = vcmp.le.f32.partialorder %v455_v30, 0.7853982 }
 0x13a   : > { %v2895_v43 = vmul.u32.u64.low %v2845_v19, %v710_v42  ;;  %v2896_v37 = vmul.u32.u64.high %v2845_v19, %v710_v42, %v2895_v43  ;;  %v540_v47 = vsel %vm457_vm6, %v539_v31, %v538_v21  ;;  %vm2151_vm14 = vcmp.lt.s32.totalorder %v2150_v34, 0 }
 0x13b   : > { %v838_v57 = vsel %vm2151_vm14, 0, %v2150_v34  ;;  %v702_v55 = vsel %vm696_vm12, %v699_v32, %v701_v39  ;;  %v543_v62 = vsel %vm2907_vm15, %v2681_v26, %v540_v47  ;;  %vm2918_vm0 = vcmp.le.f32.partialorder %v559_v27, 0.7853982 }
 0x13c   : > { %v843_v38 = vsub.s32 4294967266, %v838_v57  ;;  %v544_v30 = vsel %vm2907_vm15, 0, %v2850_v23  ;;  %2395 = vcosq.f32 %v543_v62  ;;  %v647_v17 = vsel %vm2918_vm0, %v2679_v24, %v644_v28 }
 0x13d   : > { %vm720_vm1 = vc.u32 %v2896_v37, %v2899_v18  ;;  %v721_v54 = vadd.s32 1, %v2900_v61  ;;  %2397 = vsinq.f32 %v543_v62  ;;  %v646_v27 = vsel %vm561_vm8, %v645_v20, %v2783_v58 }
 0x13e   : > { %v839_v2 = vsub.s32 32, %v838_v57  ;;  %v844_v5 = vadd.s32 127, %v843_v38  ;;  %v718_v23 = vmul.u32 %v2845_v19, %v702_v55  ;;  %v823_v7 = vadd.s32 %v2821_v3, %v2828_v56 }
 0x13f   : > { %v722_v9 = vsel %vm720_vm1, %v721_v54, %v2900_v61  ;;  %v548_v10 = vadd.s32 3, %v544_v30  ;;  %2399 = vcosq.f32 %v647_v17  ;;  %v648_v52 = vsel %vm2918_vm0, 0, %v646_v27 }
 0x140   : > { %v845_v11 = vshll.u32 %v844_v5, 23  ;;  %v723_v12 = vadd.s32 %v722_v9, %v718_v23  ;;  %2401 = vsinq.f32 %v647_v17  ;;  %v841_v48 = vshrl.u32 %v823_v7, %v839_v2 }
 0x141   : > { %v652_v58 = vadd.s32 3, %v648_v52  ;;  %v840_v20 = vshll.u32 %v2864_v46, %v838_v57  ;;  %v549_v13 = vand.u32 3, %v548_v10  ;;  %vm547_vm5 = vweird.f32 %v2681_v26 }
 0x142   : > { %v724_v51 = vadd.s32 536870912, %v723_v12  ;;  %v846_v60 = vor.u32 4788187, %v845_v11  ;;  %vm651_vm9 = vweird.f32 %v2679_v24  ;;  %vm769_vm11 = vcmp.lt.s32.totalorder %v2689_v35, 0 }
 0x143   : > { %v842_v56 = vor.u32 %v841_v48, %v840_v20  ;;  %v653_v14 = vand.u32 3, %v652_v58  ;;  %vm554_vm2 = vcmp.eq.s32.totalorder %v549_v13, 2  ;;  %vm550_vm3 = vcmp.lt.s32.totalorder %v549_v13, 2 }
 0x144   : > { %v2943_v19 = vshrl.u32 %v724_v51, 30  ;;  %v847_v16 = vand.u32 2147483647, %v846_v60  ;;  %vm551_vm4 = vcmp.eq.s32.totalorder %v549_v13, 0  ;;  %v719_v17 = vadd.s32 %v2899_v18, %v2896_v37 }
 0x145   : > { %v849_v28 = vcvt.s32.f32 %v842_v56  ;;  %vm658_vm6 = vcmp.eq.s32.totalorder %v653_v14, 2  ;;  %vm655_vm7 = vcmp.eq.s32.totalorder %v653_v14, 0  ;;  %vm654_vm8 = vcmp.lt.s32.totalorder %v653_v14, 2 }
 0x146   : > { %v2396_v3 = vpop.eup %2395  ;;  %v726_v53 = vshll.u32 %v2943_v19, 30  ;;  %vm2955_vm12 = vcmp.le.f32.partialorder %v767_v40, 0.7853982  ;;  %v853_v11 = vsub.s32 4, %v2853_v33  ;;  %v749_v48 = vsub.s32 4, %v2943_v19 }
 0x147   : > { %v2398_v44 = vpop.eup %2397  ;;  %v555_v45 = vxor.u32 2147483648, %v2396_v3  ;;  %v850_v39 = vmul.f32 %v849_v28, %v847_v16  ;;  %vm665_vm14 = vcmp.lt.s32.totalorder %v2694_v41, 0  ;;  %vm664_vm15 = vcmp.le.f32.partialorder %v663_v50, 0.7853982 }
 0x148   : > { %v727_v59 = vsub.s32 %v723_v12, %v726_v53  ;;  %v552_v21 = vxor.u32 2147483648, %v2398_v44  ;;  %v854_v40 = vsel %vm769_vm11, %v853_v11, %v2853_v33  ;;  %v750_v60 = vsel %vm665_vm14, %v749_v48, %v2943_v19 }
 0x149   : > { %v2400_v22 = vpop.eup %2399  ;;  %v556_v25 = vsel %vm554_vm2, %v555_v45, %v2398_v44  ;;  %v851_v62 = vxor.u32 2147483648, %v850_v39  ;;  %v856_v58 = vsel %vm2955_vm12, 0, %v854_v40  ;;  %v752_v53 = vsel %vm664_vm15, 0, %v750_v60 }
 0x14a   : > { %v2402_v46 = vpop.eup %2401  ;;  %v729_v32 = vsub.s32 0, %v727_v59  ;;  %v553_v36 = vsel %vm551_vm4, %v2396_v3, %v552_v21  ;;  %v659_v29 = vxor.u32 2147483648, %v2400_v22  ;;  %v860_v3 = vadd.s32 3, %v856_v58 }
 0x14b   : > { %v557_v31 = vsel %vm550_vm3, %v553_v36, %v556_v25  ;;  %v656_v34 = vxor.u32 2147483648, %v2402_v46  ;;  %v852_v30 = vsel %vm769_vm11, %v851_v62, %v850_v39  ;;  %v756_v45 = vadd.s32 3, %v752_v53 }
 0x14c   : > { %v2145_v42 = vmin.u32 %v729_v32, %v727_v59  ;;  %v660_v43 = vsel %vm658_vm6, %v659_v29, %v2402_v46  ;;  %v558_v61 = vsel %vm547_vm5, nan, %v557_v31  ;;  %v855_v7 = vsel %vm2955_vm12, %v2689_v35, %v852_v30 }
 0x14d   : > { %v657_v47 = vsel %vm655_vm7, %v2400_v22, %v656_v34  ;;  %2403 = vcosq.f32 %v855_v7  ;;  %v861_v44 = vand.u32 3, %v860_v3  ;;  %vm859_vm5 = vweird.f32 %v2689_v35  ;;  %v874_v35 = vld [vmem:[%s3643_s3 + $0x18] sm:$0xff] }
 0x14e   : > { %v731_v49 = vclz %v2145_v42  ;;  %v661_v57 = vsel %vm654_vm8, %v657_v47, %v660_v43  ;;  %2405 = vsinq.f32 %v855_v7  ;;  %vm755_vm7 = vweird.f32 %v2694_v41  ;;  %v872_v42 = vld [vmem:[%s3643_s3 + $0x8] sm:$0xff]  ;;  %v873_v43 = vld [vmem:[%s3643_s3 + $0x10] sm:$0xff]  ;;  %v882_v47 = vpop.permute.xlu0 %881 }
 0x14f   : > { %v662_v55 = vsel %vm651_vm9, nan, %v661_v57  ;;  %vm863_vm0 = vcmp.eq.s32.totalorder %v861_v44, 0  ;;  %vm866_vm1 = vcmp.eq.s32.totalorder %v861_v44, 2  ;;  %vm862_vm2 = vcmp.lt.s32.totalorder %v861_v44, 2 }
 0x150   : > { %v2146_v0 = vadd.s32 4294967294, %v731_v49  ;;  %v2272_v38 = vpack.c.bf16 %v662_v55, %v558_v61 }
 0x152   : > { %vm2147_vm10 = vcmp.lt.s32.totalorder %v2146_v0, 0  ;;  %2273 = vmatprep.subr.bf16.mxu1 %v2272_v38  ;;  %v892_v7 = vpop.permute.xlu0 %891 }
 0x153   : > { %v734_v26 = vsel %vm2147_vm10, 0, %v2146_v0  ;;  %2275 = vmatpush3.bf16.msra.mxu1 %v2272_v38 }
 0x154   : > { %v735_v54 = vsub.s32 32, %v734_v26  ;;  %v739_v27 = vsub.s32 4294967266, %v734_v26  ;;  %v736_v2 = vshll.u32 %v727_v59, %v734_v26  ;;  %v757_v59 = vand.u32 3, %v756_v45 }
 0x156   : > { %v737_v5 = vshrl.u32 %v719_v17, %v735_v54  ;;  %v740_v23 = vadd.s32 127, %v739_v27  ;;  %vm762_vm3 = vcmp.eq.s32.totalorder %v757_v59, 2  ;;  %vm759_vm4 = vcmp.eq.s32.totalorder %v757_v59, 0 }
 0x157   : > { %v2404_v56 = vpop.eup %2403  ;;  %vm758_vm6 = vcmp.lt.s32.totalorder %v757_v59, 2 }
 0x158   : > { %v738_v9 = vor.u32 %v737_v5, %v736_v2  ;;  %v741_v10 = vshll.u32 %v740_v23, 23  ;;  %v2406_v33 = vpop.eup %2405  ;;  %v867_v16 = vxor.u32 2147483648, %v2404_v56 }
 0x159   : > { %v864_v14 = vxor.u32 2147483648, %v2406_v33 }
 0x15a   : > { %v742_v37 = vor.u32 4788187, %v741_v10  ;;  %v745_v12 = vcvt.s32.f32 %v738_v9  ;;  %v868_v50 = vsel %vm866_vm1, %v867_v16, %v2406_v33 }
 0x15b   : > { %v865_v21 = vsel %vm863_vm0, %v2404_v56, %v864_v14 }
 0x15c   : > { %v743_v18 = vand.u32 2147483647, %v742_v37  ;;  %v869_v46 = vsel %vm862_vm2, %v865_v21, %v868_v50 }
 0x15d   : > { %v870_v29 = vsel %vm859_vm5, nan, %v869_v46 }
 0x15e   : > { %v746_v52 = vmul.f32 %v745_v12, %v743_v18 }
 0x160   : > { %v747_v51 = vxor.u32 2147483648, %v746_v52 }
 0x162   : > { %v748_v20 = vsel %vm665_vm14, %v747_v51, %v746_v52 }
 0x163   : > { %v751_v13 = vsel %vm664_vm15, %v2694_v41, %v748_v20  ;;  %v887_v41 = vpop.permute.xlu1 %886  ;;  %v1413_v20 = vld [vmem:[%s3645_s5] sm:$0xff] }
 0x164   : > { %2407 = vcosq.f32 %v751_v13  ;;  %2255 = vmatprep.mubr.msk.f32.mxu0 %vm899_vm13, %v1413_v20 }
 0x165   : > { %2409 = vsinq.f32 %v751_v13 }
 0x167   : > { %v897_v38 = vpop.permute.xlu1 %896 }
 0x16e   : > { %v2408_v22 = vpop.eup %2407 }
 0x16f   : > { %v2410_v19 = vpop.eup %2409  ;;  %v763_v25 = vxor.u32 2147483648, %v2408_v22 }
 0x170   : > { %v760_v28 = vxor.u32 2147483648, %v2410_v19 }
 0x171   : > { %v764_v32 = vsel %vm762_vm3, %v763_v25, %v2410_v19 }
 0x172   : > { %v761_v36 = vsel %vm759_vm4, %v2408_v22, %v760_v28 }
 0x173   : > { %v765_v31 = vsel %vm758_vm6, %v761_v36, %v764_v32 }
 0x174   : > { %v766_v34 = vsel %vm755_vm7, nan, %v765_v31 }
 0x175   : > { %v2276_v39 = vpack.c.bf16 %v870_v29, %v766_v34 }
 0x177   : > { %2277 = vmatprep.subr.bf16.mxu1 %v2276_v39 }
 0x178   : > { %2279 = vmatpush3.bf16.msra.mxu1 %v2276_v39 }
 0x17b   : > { %2242 = vmatmul.mubr.msk.f32.vlgmr.msra.gmra.mrb[0].mxu1 %vm899_vm13, %v872_v42 }
 0x17c   : > { %2244 = vmatprep.mubr.msk.f32.mxu1 %vm899_vm13, %v873_v43 }
 0x17f   : > { %2245 = vmatmul.mubr.msk.f32.gmra.mrb[2].mxu1 %vm899_vm13, %v874_v35 }
 0x24e   : > { %v2243_v61 = vpop.f32.mrb[0].mxu1 }
 0x24f   : > { %v2988_v49 = vadd.f32 %v2243_v61, %v887_v41  ;;  %v978_v57 = vpop.f32.mrb[1].mxu1 }
 0x250   : > { %v2990_v55 = vadd.f32 %v978_v57, %v882_v47 }
 0x251   : > { %v1101_v62 = vand.u32 2147483647, %v2988_v49  ;;  %v1104_v0 = vand.u32 2139095040, %v2988_v49 }
 0x252   : > { %v997_v26 = vand.u32 2147483647, %v2990_v55  ;;  %v1000_v30 = vand.u32 2139095040, %v2990_v55  ;;  %v2246_v17 = vpop.f32.mrb[2].mxu1 }
 0x253   : > { %v1105_v54 = vshrl.u32 %v1104_v0, 23  ;;  %v1108_v27 = vand.u32 8388607, %v1101_v62  ;;  %v2998_v24 = vadd.f32 %v2246_v17, %v897_v38  ;;  %v988_v2 = vpop.f32.mrb[3].mxu1 }
 0x254   : > { %v1001_v5 = vshrl.u32 %v1000_v30, 23  ;;  %v1004_v23 = vand.u32 8388607, %v997_v26  ;;  %v3004_v18 = vadd.f32 %v988_v2, %v892_v7 }
 0x255   : > { %v2160_v9 = vadd.s32 4294967169, %v1105_v54  ;;  %v1309_v10 = vand.u32 2147483647, %v2998_v24  ;;  %v1312_v37 = vand.u32 2139095040, %v2998_v24  ;;  %v1109_v12 = vor.u32 8388608, %v1108_v27 }
 0x256   : > { %v2156_v11 = vadd.s32 4294967169, %v1001_v5  ;;  %v1005_v52 = vor.u32 8388608, %v1004_v23  ;;  %v1205_v3 = vand.u32 2147483647, %v3004_v18 }
 0x257   : > { %v1111_v40 = vadd.s32 1, %v2160_v9  ;;  %v1313_v51 = vshrl.u32 %v1312_v37, 23  ;;  %v3008_v58 = vand.u32 8388607, %v1309_v10  ;;  %v3015_v53 = vshll.u32 %v1109_v12, 8 }
 0x258   : > { %v1007_v48 = vadd.s32 1, %v2156_v11  ;;  %v3019_v16 = vshll.u32 %v1005_v52, 8 }
 0x259   : > { %vm1112_vm8 = vcmp.gt.s32.totalorder %v1111_v40, 0  ;;  %v2168_v13 = vadd.s32 4294967169, %v1313_v51  ;;  %v1317_v59 = vor.u32 8388608, %v3008_v58 }
 0x25a   : > { %v1113_v60 = vsel %vm1112_vm8, %v1111_v40, 0  ;;  %vm1008_vm9 = vcmp.gt.s32.totalorder %v1007_v48, 0 }
 0x25b   : > { %v1114_v56 = vshrl.u32 %v1113_v60, 5  ;;  %v1115_v33 = vand.u32 31, %v1113_v60  ;;  %v1009_v44 = vsel %vm1008_vm9, %v1007_v48, 0  ;;  %v3024_v19 = vadd.s32 1, %v2168_v13 }
 0x25c   : > { %v3017_v45 = vshrl.u32 %v1009_v44, 5  ;;  %v1011_v14 = vand.u32 31, %v1009_v44 }
 0x25d   : > { %v1116_v21 = vsub.s32 32, %v1115_v33  ;;  %v1118_v50 = vshll.u32 %v2508_v63, %v1115_v33  ;;  %v1121_v22 = vshll.u32 %v2509_v1, %v1115_v33  ;;  %v1124_v25 = vshll.u32 %v2510_v4, %v1115_v33 }
 0x25e   : > { %v1127_v46 = vshll.u32 %v2511_v6, %v1115_v33  ;;  %v1130_v28 = vshll.u32 %v2512_v8, %v1115_v33  ;;  %vm1133_vm10 = vcmp.lt.s32.totalorder %v1114_v56, 1  ;;  %vm1134_vm11 = vcmp.lt.s32.totalorder %v1114_v56, 2 }
 0x25f   : > { %v1119_v32 = vshrl.u32 %v2509_v1, %v1116_v21  ;;  %v1122_v36 = vshrl.u32 %v2510_v4, %v1116_v21  ;;  %v1125_v29 = vshrl.u32 %v2511_v6, %v1116_v21  ;;  %v1117_v31 = vshrl.u32 %v2508_v63, %v1116_v21 }
 0x260   : > { %v1128_v34 = vshrl.u32 %v2512_v8, %v1116_v21  ;;  %v1131_v39 = vshrl.u32 %v2513_v15, %v1116_v21  ;;  %vm1135_vm12 = vcmp.lt.s32.totalorder %v1114_v56, 3  ;;  %v1012_v41 = vsub.s32 32, %v1011_v14 }
 0x261   : > { %v1120_v42 = vor.u32 %v1119_v32, %v1118_v50  ;;  %v1123_v43 = vor.u32 %v1122_v36, %v1121_v22  ;;  %v1126_v35 = vor.u32 %v1125_v29, %v1124_v25  ;;  %vm1136_vm14 = vcmp.lt.s32.totalorder %v1114_v56, 4 }
 0x262   : > { %v1129_v61 = vor.u32 %v1128_v34, %v1127_v46  ;;  %v1132_v47 = vor.u32 %v1131_v39, %v1130_v28  ;;  %v1014_v57 = vshll.u32 %v2508_v63, %v1011_v14  ;;  %v1017_v5 = vshll.u32 %v2509_v1, %v1011_v14 }
 0x263   : > { %v1137_v0 = vsel %vm1133_vm10, %v1117_v31, %v1120_v42  ;;  %v1138_v38 = vsel %vm1136_vm14, %v1126_v35, 2102212464  ;;  %v1141_v30 = vsel %vm1133_vm10, %v1120_v42, %v1123_v43  ;;  %v1145_v17 = vsel %vm1133_vm10, %v1123_v43, %v1126_v35 }
 0x264   : > { %v1139_v54 = vsel %vm1135_vm12, %v1123_v43, %v1138_v38  ;;  %v1142_v27 = vsel %vm1136_vm14, %v1129_v61, 920167782  ;;  %v1146_v2 = vsel %vm1136_vm14, %v1132_v47, 1326507024  ;;  %v1013_v9 = vshrl.u32 %v2508_v63, %v1012_v41 }
 0x265   : > { %v1143_v23 = vsel %vm1135_vm12, %v1126_v35, %v1142_v27  ;;  %v1147_v7 = vsel %vm1135_vm12, %v1129_v61, %v1146_v2  ;;  %v1015_v11 = vshrl.u32 %v2509_v1, %v1012_v41  ;;  %v1140_v37 = vsel %vm1134_vm11, %v1137_v0, %v1139_v54 }
 0x266   : > { %v1144_v12 = vsel %vm1134_vm11, %v1141_v30, %v1143_v23  ;;  %v1148_v40 = vsel %vm1134_vm11, %v1145_v17, %v1147_v7  ;;  %v1018_v52 = vshrl.u32 %v2510_v4, %v1012_v41  ;;  %v1020_v44 = vshll.u32 %v2510_v4, %v1011_v14 }
 0x267   : > { %v3050_v48 = vmul.u32.u64.low %v3015_v53, %v1148_v40  ;;  %v3051_v51 = vmul.u32.u64.high %v3015_v53, %v1148_v40, %v3050_v48  ;;  %v3054_v20 = vmul.u32.u64.low %v3015_v53, %v1144_v12  ;;  %v3055_v60 = vmul.u32.u64.high %v3015_v53, %v1144_v12, %v3054_v20 }
 0x268   : > { %v1016_v13 = vor.u32 %v1015_v11, %v1014_v57  ;;  %v1019_v33 = vor.u32 %v1018_v52, %v1017_v5  ;;  %v1021_v21 = vshrl.u32 %v2511_v6, %v1012_v41  ;;  %v1156_v50 = vmul.u32 %v3015_v53, %v1140_v37 }
 0x269   : > { %v1023_v56 = vshll.u32 %v2511_v6, %v1011_v14  ;;  %v1024_v22 = vshrl.u32 %v2512_v8, %v1012_v41  ;;  %v1027_v25 = vshrl.u32 %v2513_v15, %v1012_v41  ;;  %v1026_v28 = vshll.u32 %v2512_v8, %v1011_v14 }
 0x26a   : > { %v1022_v46 = vor.u32 %v1021_v21, %v1020_v44  ;;  %vm1029_vm15 = vcmp.lt.s32.totalorder %v3017_v45, 1  ;;  %vm1030_vm0 = vcmp.lt.s32.totalorder %v3017_v45, 2  ;;  %vm1158_vm1 = vc.u32 %v3051_v51, %v3054_v20 }
 0x26b   : > { %v1159_v32 = vadd.s32 1, %v3055_v60  ;;  %v1025_v36 = vor.u32 %v1024_v22, %v1023_v56  ;;  %vm1031_vm2 = vcmp.lt.s32.totalorder %v3017_v45, 3  ;;  %v1028_v53 = vor.u32 %v1027_v25, %v1026_v28 }
 0x26c   : > { %vm1032_vm3 = vcmp.lt.s32.totalorder %v3017_v45, 4  ;;  %v1033_v29 = vsel %vm1029_vm15, %v1013_v9, %v1016_v13  ;;  %v1037_v31 = vsel %vm1029_vm15, %v1016_v13, %v1019_v33  ;;  %v1041_v42 = vsel %vm1029_vm15, %v1019_v33, %v1022_v46 }
 0x26d   : > { %v1160_v34 = vsel %vm1158_vm1, %v1159_v32, %v3055_v60  ;;  %v1034_v39 = vsel %vm1032_vm3, %v1022_v46, 2102212464  ;;  %v1038_v14 = vsel %vm1032_vm3, %v1025_v36, 920167782  ;;  %v1042_v61 = vsel %vm1032_vm3, %v1028_v53, 1326507024 }
 0x26e   : > { %v1161_v43 = vadd.s32 %v1160_v34, %v1156_v50  ;;  %v1035_v35 = vsel %vm1031_vm2, %v1019_v33, %v1034_v39  ;;  %v1039_v41 = vsel %vm1031_vm2, %v1022_v46, %v1038_v14  ;;  %v1043_v57 = vsel %vm1031_vm2, %v1025_v36, %v1042_v61 }
 0x26f   : > { %v1040_v47 = vsel %vm1030_vm0, %v1037_v31, %v1039_v41  ;;  %vm1320_vm4 = vcmp.gt.s32.totalorder %v3024_v19, 0  ;;  %v1208_v0 = vand.u32 2139095040, %v3004_v18  ;;  %v1044_v30 = vsel %vm1030_vm0, %v1041_v42, %v1043_v57 }
 0x270   : > { %v1162_v38 = vadd.s32 536870912, %v1161_v43  ;;  %v3078_v17 = vmul.u32.u64.low %v3019_v16, %v1040_v47  ;;  %v3079_v54 = vmul.u32.u64.high %v3019_v16, %v1040_v47, %v3078_v17  ;;  %v1036_v27 = vsel %vm1030_vm0, %v1033_v29, %v1035_v35 }
 0x271   : > { %v3085_v2 = vmul.u32.u64.low %v3019_v16, %v1044_v30  ;;  %v3086_v5 = vmul.u32.u64.high %v3019_v16, %v1044_v30, %v3085_v2  ;;  %v1321_v23 = vsel %vm1320_vm4, %v3024_v19, 0  ;;  %v3092_v11 = vadd.s32 %v3054_v20, %v3051_v51 }
 0x272   : > { %v3089_v7 = vshrl.u32 %v1162_v38, 30  ;;  %v1323_v9 = vand.u32 31, %v1321_v23  ;;  %v3096_v37 = vshll.u32 %v1317_v59, 8  ;;  %v1209_v12 = vshrl.u32 %v1208_v0, 23 }
 0x273   : > { %v3100_v45 = vand.u32 8388607, %v1205_v3  ;;  %v1052_v52 = vmul.u32 %v3019_v16, %v1036_v27  ;;  %v1055_v19 = vadd.s32 1, %v3079_v54  ;;  %vm1054_vm5 = vc.u32 %v3086_v5, %v3078_v17 }
 0x274   : > { %v1164_v40 = vshll.u32 %v3089_v7, 30  ;;  %v1324_v48 = vsub.s32 32, %v1323_v9  ;;  %v1322_v51 = vshrl.u32 %v1321_v23, 5  ;;  %v1326_v58 = vshll.u32 %v2508_v63, %v1323_v9 }
 0x275   : > { %v1329_v59 = vshll.u32 %v2509_v1, %v1323_v9  ;;  %v1056_v60 = vsel %vm1054_vm5, %v1055_v19, %v3079_v54  ;;  %v1332_v33 = vshll.u32 %v2510_v4, %v1323_v9  ;;  %v1335_v50 = vshll.u32 %v2511_v6, %v1323_v9 }
 0x276   : > { %v3109_v20 = vsub.s32 %v1161_v43, %v1164_v40  ;;  %v1327_v13 = vshrl.u32 %v2509_v1, %v1324_v48  ;;  %v1057_v16 = vadd.s32 %v1056_v60, %v1052_v52  ;;  %v1330_v44 = vshrl.u32 %v2510_v4, %v1324_v48 }
 0x277   : > { %v1333_v21 = vshrl.u32 %v2511_v6, %v1324_v48  ;;  %v1336_v25 = vshrl.u32 %v2512_v8, %v1324_v48  ;;  %v1338_v46 = vshll.u32 %v2512_v8, %v1323_v9  ;;  %v1339_v53 = vshrl.u32 %v2513_v15, %v1324_v48 }
 0x278   : > { %v1167_v56 = vsub.s32 0, %v3109_v20  ;;  %v1328_v22 = vor.u32 %v1327_v13, %v1326_v58  ;;  %v1058_v28 = vadd.s32 536870912, %v1057_v16  ;;  %v1331_v32 = vor.u32 %v1330_v44, %v1329_v59 }
 0x279   : > { %v1334_v36 = vor.u32 %v1333_v21, %v1332_v33  ;;  %v1325_v31 = vshrl.u32 %v2508_v63, %v1324_v48  ;;  %v1337_v34 = vor.u32 %v1336_v25, %v1335_v50  ;;  %v2164_v39 = vadd.s32 4294967169, %v1209_v12 }
 0x27a   : > { %v2161_v29 = vmin.u32 %v1167_v56, %v3109_v20  ;;  %v3123_v14 = vshrl.u32 %v1058_v28, 30  ;;  %v1340_v42 = vor.u32 %v1339_v53, %v1338_v46  ;;  %vm1341_vm6 = vcmp.lt.s32.totalorder %v1322_v51, 1 }
 0x27b   : > { %vm1344_vm7 = vcmp.lt.s32.totalorder %v1322_v51, 4  ;;  %vm1342_vm8 = vcmp.lt.s32.totalorder %v1322_v51, 2  ;;  %v1349_v41 = vsel %vm1341_vm6, %v1328_v22, %v1331_v32  ;;  %vm1343_vm9 = vcmp.lt.s32.totalorder %v1322_v51, 3 }
 0x27c   : > { %v1169_v43 = vclz %v2161_v29  ;;  %v1346_v35 = vsel %vm1344_vm7, %v1334_v36, 2102212464  ;;  %v1060_v61 = vshll.u32 %v3123_v14, 30  ;;  %v1350_v47 = vsel %vm1344_vm7, %v1337_v34, 920167782 }
 0x27d   : > { %v1353_v57 = vsel %vm1341_vm6, %v1331_v32, %v1334_v36  ;;  %v1345_v38 = vsel %vm1341_vm6, %v1325_v31, %v1328_v22  ;;  %v1351_v30 = vsel %vm1343_vm9, %v1334_v36, %v1350_v47  ;;  %v1354_v54 = vsel %vm1344_vm7, %v1340_v42, 1326507024 }
 0x27e   : > { %v2162_v0 = vadd.s32 4294967294, %v1169_v43  ;;  %v3126_v27 = vsub.s32 %v1057_v16, %v1060_v61  ;;  %v1347_v2 = vsel %vm1343_vm9, %v1331_v32, %v1346_v35  ;;  %v1352_v23 = vsel %vm1342_vm8, %v1349_v41, %v1351_v30 }
 0x27f   : > { %v1355_v9 = vsel %vm1343_vm9, %v1337_v34, %v1354_v54  ;;  %v3131_v40 = vmul.u32.u64.low %v3096_v37, %v1352_v23  ;;  %v3132_v52 = vmul.u32.u64.high %v3096_v37, %v1352_v23, %v3131_v40  ;;  %v1348_v33 = vsel %vm1342_vm8, %v1345_v38, %v1347_v2 }
 0x280   : > { %vm2163_vm10 = vcmp.lt.s32.totalorder %v2162_v0, 0  ;;  %v1356_v12 = vsel %vm1342_vm8, %v1353_v57, %v1355_v9  ;;  %v1063_v48 = vsub.s32 0, %v3126_v27  ;;  %v1215_v16 = vadd.s32 1, %v2164_v39 }
 0x281   : > { %v1172_v19 = vsel %vm2163_vm10, 0, %v2162_v0  ;;  %v3137_v58 = vmul.u32.u64.low %v3096_v37, %v1356_v12  ;;  %v3138_v59 = vmul.u32.u64.high %v3096_v37, %v1356_v12, %v3137_v58  ;;  %v1213_v50 = vor.u32 8388608, %v3100_v45 }
 0x282   : > { %v1173_v60 = vsub.s32 32, %v1172_v19  ;;  %v1177_v13 = vsub.s32 4294967266, %v1172_v19  ;;  %v1174_v44 = vshll.u32 %v3109_v20, %v1172_v19  ;;  %v2157_v21 = vmin.u32 %v1063_v48, %v3126_v27 }
 0x283   : > { %v1367_v25 = vadd.s32 1, %v3132_v52  ;;  %vm1216_vm11 = vcmp.gt.s32.totalorder %v1215_v16, 0  ;;  %v1364_v28 = vmul.u32 %v3096_v37, %v1348_v33  ;;  %vm1366_vm12 = vc.u32 %v3138_v59, %v3131_v40 }
 0x284   : > { %v1175_v56 = vshrl.u32 %v3092_v11, %v1173_v60  ;;  %v1178_v22 = vadd.s32 127, %v1177_v13  ;;  %v1065_v46 = vclz %v2157_v21  ;;  %v1217_v51 = vsel %vm1216_vm11, %v1215_v16, 0 }
 0x285   : > { %v1053_v20 = vadd.s32 %v3078_v17, %v3086_v5  ;;  %v1368_v45 = vsel %vm1366_vm12, %v1367_v25, %v3132_v52  ;;  %vm1103_vm14 = vcmp.lt.s32.totalorder %v2988_v49, 0  ;;  %v3153_v29 = vshrl.u32 %v1217_v51, 5 }
 0x286   : > { %v1176_v32 = vor.u32 %v1175_v56, %v1174_v44  ;;  %v1179_v36 = vshll.u32 %v1178_v22, 23  ;;  %v2158_v11 = vadd.s32 4294967294, %v1065_v46  ;;  %v1369_v53 = vadd.s32 %v1368_v45, %v1364_v28 }
 0x287   : > { %v1219_v31 = vand.u32 31, %v1217_v51  ;;  %vm3157_vm15 = vcmp.le.f32.partialorder %v1101_v62, 0.7853982  ;;  %v3161_v39 = vshll.u32 %v1213_v50, 8  ;;  %v1083_v17 = vsub.s32 4, %v3123_v14 }
 0x288   : > { %v1180_v34 = vor.u32 4788187, %v1179_v36  ;;  %v1187_v5 = vsub.s32 4, %v3089_v7  ;;  %v1183_v42 = vcvt.s32.f32 %v1176_v32  ;;  %vm2159_vm0 = vcmp.lt.s32.totalorder %v2158_v11, 0 }
 0x289   : > { %v1370_v43 = vadd.s32 536870912, %v1369_v53  ;;  %v1220_v35 = vsub.s32 32, %v1219_v31  ;;  %v1068_v61 = vsel %vm2159_vm0, 0, %v2158_v11  ;;  %v1222_v47 = vshll.u32 %v2508_v63, %v1219_v31 }
 0x28a   : > { %v1181_v41 = vand.u32 2147483647, %v1180_v34  ;;  %v1225_v62 = vshll.u32 %v2509_v1, %v1219_v31  ;;  %v1069_v57 = vsub.s32 32, %v1068_v61  ;;  %v1073_v0 = vsub.s32 4294967266, %v1068_v61 }
 0x28b   : > { %v3167_v38 = vshrl.u32 %v1370_v43, 30  ;;  %v1228_v30 = vshll.u32 %v2510_v4, %v1219_v31  ;;  %vm1237_vm1 = vcmp.lt.s32.totalorder %v3153_v29, 1  ;;  %v1070_v2 = vshll.u32 %v3126_v27, %v1068_v61 }
 0x28c   : > { %v1184_v54 = vmul.f32 %v1183_v42, %v1181_v41  ;;  %v1223_v23 = vshrl.u32 %v2509_v1, %v1220_v35  ;;  %v1226_v9 = vshrl.u32 %v2510_v4, %v1220_v35  ;;  %v1071_v12 = vshrl.u32 %v1053_v20, %v1069_v57 }
 0x28d   : > { %v1074_v52 = vadd.s32 127, %v1073_v0  ;;  %v1372_v19 = vshll.u32 %v3167_v38, 30  ;;  %v1229_v48 = vshrl.u32 %v2511_v6, %v1220_v35  ;;  %v1231_v33 = vshll.u32 %v2511_v6, %v1219_v31 }
 0x28e   : > { %v1185_v58 = vxor.u32 2147483648, %v1184_v54  ;;  %v1224_v60 = vor.u32 %v1223_v23, %v1222_v47  ;;  %v1227_v13 = vor.u32 %v1226_v9, %v1225_v62  ;;  %vm999_vm2 = vcmp.lt.s32.totalorder %v2990_v55, 0 }
 0x28f   : > { %v1072_v16 = vor.u32 %v1071_v12, %v1070_v2  ;;  %v1075_v44 = vshll.u32 %v1074_v52, 23  ;;  %v3178_v27 = vsub.s32 %v1369_v53, %v1372_v19  ;;  %v1230_v21 = vor.u32 %v1229_v48, %v1228_v30 }
 0x290   : > { %v1186_v50 = vsel %vm1103_vm14, %v1185_v58, %v1184_v54  ;;  %v1232_v56 = vshrl.u32 %v2512_v8, %v1220_v35  ;;  %v1234_v22 = vshll.u32 %v2512_v8, %v1219_v31  ;;  %v1235_v25 = vshrl.u32 %v2513_v15, %v1220_v35 }
 0x291   : > { %v1189_v46 = vsel %vm3157_vm15, %v2988_v49, %v1186_v50  ;;  %vm3190_vm3 = vcmp.le.f32.partialorder %v997_v26, 0.7853982  ;;  %v1076_v51 = vor.u32 4788187, %v1075_v44  ;;  %v1375_v32 = vsub.s32 0, %v3178_v27 }
 0x292   : > { %v1221_v36 = vshrl.u32 %v2508_v63, %v1220_v35  ;;  %2411 = vcosq.f32 %v1189_v46  ;;  %v1079_v20 = vcvt.s32.f32 %v1072_v16  ;;  %v1233_v45 = vor.u32 %v1232_v56, %v1231_v33 }
 0x293   : > { %v1236_v11 = vor.u32 %v1235_v25, %v1234_v22  ;;  %2413 = vsinq.f32 %v1189_v46  ;;  %v1077_v53 = vand.u32 2147483647, %v1076_v51  ;;  %v2169_v31 = vmin.u32 %v1375_v32, %v3178_v27 }
 0x294   : > { %vm1240_vm4 = vcmp.lt.s32.totalorder %v3153_v29, 4  ;;  %vm1239_vm5 = vcmp.lt.s32.totalorder %v3153_v29, 3  ;;  %v1245_v34 = vsel %vm1237_vm1, %v1224_v60, %v1227_v13  ;;  %vm1238_vm6 = vcmp.lt.s32.totalorder %v3153_v29, 2 }
 0x295   : > { %v1242_v26 = vsel %vm1240_vm4, %v1230_v21, 2102212464  ;;  %v1246_v42 = vsel %vm1240_vm4, %v1233_v45, 920167782  ;;  %v1080_v43 = vmul.f32 %v1079_v20, %v1077_v53  ;;  %v1377_v41 = vclz %v2169_v31 }
 0x296   : > { %v1247_v35 = vsel %vm1239_vm5, %v1230_v21, %v1246_v42  ;;  %v1241_v61 = vsel %vm1237_vm1, %v1221_v36, %v1224_v60  ;;  %v1249_v62 = vsel %vm1237_vm1, %v1227_v13, %v1230_v21  ;;  %v1250_v57 = vsel %vm1240_vm4, %v1236_v11, 1326507024 }
 0x297   : > { %v1248_v47 = vsel %vm1238_vm6, %v1245_v34, %v1247_v35  ;;  %v1081_v0 = vxor.u32 2147483648, %v1080_v43  ;;  %v2170_v30 = vadd.s32 4294967294, %v1377_v41  ;;  %v1243_v54 = vsel %vm1239_vm5, %v1227_v13, %v1242_v26 }
 0x298   : > { %v1251_v2 = vsel %vm1239_vm5, %v1233_v45, %v1250_v57  ;;  %v3211_v9 = vmul.u32.u64.low %v3161_v39, %v1248_v47  ;;  %v3212_v12 = vmul.u32.u64.high %v3161_v39, %v1248_v47, %v3211_v9  ;;  %v1084_v52 = vsel %vm999_vm2, %v1083_v17, %v3123_v14 }
 0x299   : > { %v1252_v23 = vsel %vm1238_vm6, %v1249_v62, %v1251_v2  ;;  %v1082_v19 = vsel %vm999_vm2, %v1081_v0, %v1080_v43  ;;  %vm2171_vm7 = vcmp.lt.s32.totalorder %v2170_v30, 0  ;;  %v1244_v33 = vsel %vm1238_vm6, %v1241_v61, %v1243_v54 }
 0x29a   : > { %v3223_v48 = vmul.u32.u64.low %v3161_v39, %v1252_v23  ;;  %v3224_v58 = vmul.u32.u64.high %v3161_v39, %v1252_v23, %v3223_v48  ;;  %v1085_v60 = vsel %vm3190_vm3, %v2990_v55, %v1082_v19  ;;  %v1380_v13 = vsel %vm2171_vm7, 0, %v2170_v30 }
 0x29b   : > { %v1188_v14 = vsel %vm1103_vm14, %v1187_v5, %v3089_v7  ;;  %2415 = vcosq.f32 %v1085_v60  ;;  %v1385_v17 = vsub.s32 4294967266, %v1380_v13  ;;  %v1086_v16 = vsel %vm3190_vm3, 0, %v1084_v52 }
 0x29c   : > { %v2412_v44 = vpop.eup %2411  ;;  %2417 = vsinq.f32 %v1085_v60  ;;  %v1263_v21 = vadd.s32 1, %v3212_v12  ;;  %v1190_v50 = vsel %vm3157_vm15, 0, %v1188_v14  ;;  %v1381_v56 = vsub.s32 32, %v1380_v13 }
 0x29d   : > { %v2414_v29 = vpop.eup %2413  ;;  %v1386_v22 = vadd.s32 127, %v1385_v17  ;;  %v1260_v25 = vmul.u32 %v3161_v39, %v1244_v33  ;;  %vm1262_vm8 = vc.u32 %v3224_v58, %v3211_v9  ;;  %v1090_v5 = vadd.s32 3, %v1086_v16 }
 0x29e   : > { %v1264_v7 = vsel %vm1262_vm8, %v1263_v21, %v3212_v12  ;;  %v1365_v46 = vadd.s32 %v3131_v40, %v3138_v59  ;;  %v1194_v32 = vadd.s32 3, %v1190_v50  ;;  %v1198_v36 = vxor.u32 2147483648, %v2414_v29 }
 0x29f   : > { %v1387_v28 = vshll.u32 %v1386_v22, 23  ;;  %v1265_v51 = vadd.s32 %v1264_v7, %v1260_v25  ;;  %v1201_v11 = vxor.u32 2147483648, %v2412_v44  ;;  %v1091_v53 = vand.u32 3, %v1090_v5 }
 0x2a0   : > { %v1383_v37 = vshrl.u32 %v1365_v46, %v1381_v56  ;;  %v1195_v45 = vand.u32 3, %v1194_v32  ;;  %v1382_v39 = vshll.u32 %v3178_v27, %v1380_v13  ;;  %vm1193_vm14 = vweird.f32 %v2988_v49 }
 0x2a1   : > { %v1266_v20 = vadd.s32 536870912, %v1265_v51  ;;  %v1388_v31 = vor.u32 4788187, %v1387_v28  ;;  %vm1096_vm12 = vcmp.eq.s32.totalorder %v1091_v53, 2  ;;  %vm1093_vm15 = vcmp.eq.s32.totalorder %v1091_v53, 0 }
 0x2a2   : > { %vm1197_vm9 = vcmp.eq.s32.totalorder %v1195_v45, 0  ;;  %vm1200_vm10 = vcmp.eq.s32.totalorder %v1195_v45, 2  ;;  %v1384_v43 = vor.u32 %v1383_v37, %v1382_v39  ;;  %vm1196_vm11 = vcmp.lt.s32.totalorder %v1195_v45, 2 }
 0x2a3   : > { %v3248_v26 = vshrl.u32 %v1266_v20, 30  ;;  %v1199_v34 = vsel %vm1197_vm9, %v2412_v44, %v1198_v36  ;;  %v1202_v59 = vsel %vm1200_vm10, %v1201_v11, %v2414_v29  ;;  %v1389_v47 = vand.u32 2147483647, %v1388_v31 }
 0x2a4   : > { %v1203_v61 = vsel %vm1196_vm11, %v1199_v34, %v1202_v59  ;;  %v1391_v30 = vcvt.s32.f32 %v1384_v43  ;;  %vm1092_vm0 = vcmp.lt.s32.totalorder %v1091_v53, 2  ;;  %vm1089_vm1 = vweird.f32 %v2990_v55 }
 0x2a5   : > { %v2416_v42 = vpop.eup %2415  ;;  %v1268_v40 = vshll.u32 %v3248_v26, 30  ;;  %v1204_v57 = vsel %vm1193_vm14, nan, %v1203_v61  ;;  %vm1311_vm3 = vcmp.lt.s32.totalorder %v2998_v24, 0  ;;  %v1261_v55 = vadd.s32 %v3211_v9, %v3224_v58 }
 0x2a6   : > { %v2418_v41 = vpop.eup %2417  ;;  %v1097_v35 = vxor.u32 2147483648, %v2416_v42  ;;  %v1392_v12 = vmul.f32 %v1391_v30, %v1389_v47  ;;  %vm3260_vm4 = vcmp.le.f32.partialorder %v1309_v10, 0.7853982  ;;  %v1395_v7 = vsub.s32 4, %v3167_v38 }
 0x2a7   : > { %v1269_v27 = vsub.s32 %v1265_v51, %v1268_v40  ;;  %v1094_v62 = vxor.u32 2147483648, %v2418_v41  ;;  %v1291_v28 = vsub.s32 4, %v3248_v26  ;;  %vm1207_vm5 = vcmp.lt.s32.totalorder %v3004_v18, 0 }
 0x2a8   : > { %v1098_v0 = vsel %vm1096_vm12, %v1097_v35, %v2418_v41  ;;  %v1393_v49 = vxor.u32 2147483648, %v1392_v12  ;;  %v1396_v10 = vsel %vm1311_vm3, %v1395_v7, %v3167_v38  ;;  %vm1206_vm6 = vcmp.le.f32.partialorder %v1205_v3, 0.7853982 }
 0x2a9   : > { %v1271_v54 = vsub.s32 0, %v1269_v27  ;;  %v1095_v2 = vsel %vm1093_vm15, %v2416_v42, %v1094_v62  ;;  %v1398_v32 = vsel %vm3260_vm4, 0, %v1396_v10  ;;  %v1292_v37 = vsel %vm1207_vm5, %v1291_v28, %v3248_v26 }
 0x2aa   : > { %v1099_v23 = vsel %vm1092_vm0, %v1095_v2, %v1098_v0  ;;  %v1394_v14 = vsel %vm1311_vm3, %v1393_v49, %v1392_v12  ;;  %v1402_v45 = vadd.s32 3, %v1398_v32  ;;  %v1294_v53 = vsel %vm1206_vm6, 0, %v1292_v37  ;;  %v1415_v2 = vld [vmem:[%s3645_s5 + $0x10] sm:$0xff]  ;;  %v1424_v12 = vpop.permute.xlu0 %1423 }
 0x2ab   : > { %v2165_v52 = vmin.u32 %v1271_v54, %v1269_v27  ;;  %v1100_v19 = vsel %vm1089_vm1, nan, %v1099_v23  ;;  %v1397_v56 = vsel %vm3260_vm4, %v2998_v24, %v1394_v14  ;;  %v1298_v31 = vadd.s32 3, %v1294_v53  ;;  %v1414_v54 = vld [vmem:[%s3645_s5 + $0x8] sm:$0xff] }
 0x2ac   : > { %v2280_v48 = vpack.c.bf16 %v1204_v57, %v1100_v19  ;;  %2419 = vcosq.f32 %v1397_v56  ;;  %v1403_v39 = vand.u32 3, %v1402_v45  ;;  %vm1401_vm12 = vweird.f32 %v2998_v24  ;;  %v1416_v24 = vld [vmem:[%s3645_s5 + $0x18] sm:$0xff] }
 0x2ad   : > { %v1273_v60 = vclz %v2165_v52  ;;  %2421 = vsinq.f32 %v1397_v56  ;;  %v1299_v43 = vand.u32 3, %v1298_v31  ;;  %vm1297_vm15 = vweird.f32 %v3004_v18 }
 0x2ae   : > { %2281 = vmatprep.subr.bf16.mxu0 %v2280_v48  ;;  %vm1405_vm7 = vcmp.eq.s32.totalorder %v1403_v39, 0  ;;  %vm1408_vm8 = vcmp.eq.s32.totalorder %v1403_v39, 2  ;;  %vm1404_vm9 = vcmp.lt.s32.totalorder %v1403_v39, 2  ;;  %v1434_v56 = vpop.permute.xlu0 %1433 }
 0x2af   : > { %v2166_v13 = vadd.s32 4294967294, %v1273_v60  ;;  %2283 = vmatpush3.bf16.msra.mxu0 %v2280_v48  ;;  %vm1304_vm10 = vcmp.eq.s32.totalorder %v1299_v43, 2  ;;  %vm1301_vm11 = vcmp.eq.s32.totalorder %v1299_v43, 0  ;;  %vm1300_vm14 = vcmp.lt.s32.totalorder %v1299_v43, 2 }
 0x2b1   : > { %vm2167_vm2 = vcmp.lt.s32.totalorder %v2166_v13, 0 }
 0x2b2   : > { %v1276_v33 = vsel %vm2167_vm2, 0, %v2166_v13 }
 0x2b3   : > { %v1277_v17 = vsub.s32 32, %v1276_v33  ;;  %v1281_v16 = vsub.s32 4294967266, %v1276_v33  ;;  %v1278_v21 = vshll.u32 %v1269_v27, %v1276_v33 }
 0x2b5   : > { %v1279_v50 = vshrl.u32 %v1261_v55, %v1277_v17  ;;  %v1282_v29 = vadd.s32 127, %v1281_v16 }
 0x2b6   : > { %v2420_v11 = vpop.eup %2419 }
 0x2b7   : > { %v1280_v22 = vor.u32 %v1279_v50, %v1278_v21  ;;  %v1283_v25 = vshll.u32 %v1282_v29, 23  ;;  %v2422_v38 = vpop.eup %2421  ;;  %v1409_v42 = vxor.u32 2147483648, %v2420_v11 }
 0x2b8   : > { %v1406_v34 = vxor.u32 2147483648, %v2422_v38 }
 0x2b9   : > { %v1284_v9 = vor.u32 4788187, %v1283_v25  ;;  %v1287_v5 = vcvt.s32.f32 %v1280_v22  ;;  %v1410_v3 = vsel %vm1408_vm8, %v1409_v42, %v2422_v38 }
 0x2ba   : > { %v1407_v40 = vsel %vm1405_vm7, %v2420_v11, %v1406_v34 }
 0x2bb   : > { %v1285_v58 = vand.u32 2147483647, %v1284_v9  ;;  %v1411_v35 = vsel %vm1404_vm9, %v1407_v40, %v1410_v3 }
 0x2bc   : > { %v1412_v62 = vsel %vm1401_vm12, nan, %v1411_v35 }
 0x2bd   : > { %v1288_v46 = vmul.f32 %v1287_v5, %v1285_v58 }
 0x2bf   : > { %v1289_v51 = vxor.u32 2147483648, %v1288_v46 }
 0x2c1   : > { %v1290_v36 = vsel %vm1207_vm5, %v1289_v51, %v1288_v46 }
 0x2c2   : > { %v1293_v20 = vsel %vm1206_vm6, %v3004_v18, %v1290_v36  ;;  %v1429_v18 = vpop.permute.xlu1 %1428  ;;  %v1954_v36 = vld [vmem:[%s3647_s7] sm:$0xff] }
 0x2c3   : > { %2423 = vcosq.f32 %v1293_v20  ;;  %2269 = vmatprep.mubr.msk.f32.mxu1 %vm899_vm13, %v1954_v36 }
 0x2c4   : > { %2425 = vsinq.f32 %v1293_v20 }
 0x2c6   : > { %v1439_v13 = vpop.permute.xlu1 %1438 }
 0x2cd   : > { %v2424_v59 = vpop.eup %2423 }
 0x2ce   : > { %v2426_v26 = vpop.eup %2425  ;;  %v1305_v41 = vxor.u32 2147483648, %v2424_v59 }
 0x2cf   : > { %v1302_v61 = vxor.u32 2147483648, %v2426_v26 }
 0x2d0   : > { %v1306_v47 = vsel %vm1304_vm10, %v1305_v41, %v2426_v26 }
 0x2d1   : > { %v1303_v27 = vsel %vm1301_vm11, %v2424_v59, %v1302_v61 }
 0x2d2   : > { %v1307_v57 = vsel %vm1300_vm14, %v1303_v27, %v1306_v47 }
 0x2d3   : > { %v1308_v0 = vsel %vm1297_vm15, nan, %v1307_v57 }
 0x2d4   : > { %v2284_v30 = vpack.c.bf16 %v1412_v62, %v1308_v0 }
 0x2d6   : > { %2285 = vmatprep.subr.bf16.mxu0 %v2284_v30 }
 0x2d7   : > { %2287 = vmatpush3.bf16.msra.mxu0 %v2284_v30 }
 0x2da   : > { %2256 = vmatmul.mubr.msk.f32.vlgmr.msra.gmra.mrb[4].mxu0 %vm899_vm13, %v1414_v54 }
 0x2db   : > { %2258 = vmatprep.mubr.msk.f32.mxu0 %vm899_vm13, %v1415_v2 }
 0x2de   : > { %2259 = vmatmul.mubr.msk.f32.gmra.mrb[6].mxu0 %vm899_vm13, %v1416_v24 }
 0x3ad   : > { %v2257_v23 = vpop.f32.mrb[4].mxu0 }
 0x3ae   : > { %v3293_v52 = vadd.f32 %v2257_v23, %v1429_v18  ;;  %v1519_v19 = vpop.f32.mrb[5].mxu0 }
 0x3af   : > { %v3295_v48 = vadd.f32 %v1519_v19, %v1424_v12 }
 0x3b0   : > { %v1642_v60 = vand.u32 2147483647, %v3293_v52  ;;  %v1645_v49 = vand.u32 2139095040, %v3293_v52 }
 0x3b1   : > { %v1538_v33 = vand.u32 2147483647, %v3295_v48  ;;  %v1541_v14 = vand.u32 2139095040, %v3295_v48  ;;  %v2260_v55 = vpop.f32.mrb[6].mxu0 }
 0x3b2   : > { %v1646_v17 = vshrl.u32 %v1645_v49, 23  ;;  %v1649_v16 = vand.u32 8388607, %v1642_v60  ;;  %v3303_v44 = vadd.f32 %v2260_v55, %v1439_v13  ;;  %v1529_v21 = vpop.f32.mrb[7].mxu0 }
 0x3b3   : > { %v1542_v50 = vshrl.u32 %v1541_v14, 23  ;;  %v1545_v29 = vand.u32 8388607, %v1538_v33  ;;  %v3309_v58 = vadd.f32 %v1529_v21, %v1434_v56 }
 0x3b4   : > { %v2180_v22 = vadd.s32 4294967169, %v1646_v17  ;;  %v1850_v25 = vand.u32 2147483647, %v3303_v44  ;;  %v1853_v9 = vand.u32 2139095040, %v3303_v44  ;;  %v1650_v5 = vor.u32 8388608, %v1649_v16 }
 0x3b5   : > { %v2176_v7 = vadd.s32 4294967169, %v1542_v50  ;;  %v1546_v46 = vor.u32 8388608, %v1545_v29  ;;  %v1746_v45 = vand.u32 2147483647, %v3309_v58 }
 0x3b6   : > { %v1652_v10 = vadd.s32 1, %v2180_v22  ;;  %v1854_v51 = vshrl.u32 %v1853_v9, 23  ;;  %v3313_v32 = vand.u32 8388607, %v1850_v25  ;;  %v3320_v53 = vshll.u32 %v1650_v5, 8 }
 0x3b7   : > { %v1548_v28 = vadd.s32 1, %v2176_v7  ;;  %v3324_v42 = vshll.u32 %v1546_v46, 8 }
 0x3b8   : > { %vm1653_vm0 = vcmp.gt.s32.totalorder %v1652_v10, 0  ;;  %v2188_v20 = vadd.s32 4294967169, %v1854_v51  ;;  %v1858_v43 = vor.u32 8388608, %v3313_v32 }
 0x3b9   : > { %v1654_v37 = vsel %vm1653_vm0, %v1652_v10, 0  ;;  %vm1549_vm1 = vcmp.gt.s32.totalorder %v1548_v28, 0 }
 0x3ba   : > { %v1655_v11 = vshrl.u32 %v1654_v37, 5  ;;  %v1656_v38 = vand.u32 31, %v1654_v37  ;;  %v1550_v39 = vsel %vm1549_vm1, %v1548_v28, 0  ;;  %v3329_v26 = vadd.s32 1, %v2188_v20 }
 0x3bb   : > { %v3322_v31 = vshrl.u32 %v1550_v39, 5  ;;  %v1552_v34 = vand.u32 31, %v1550_v39 }
 0x3bc   : > { %v1657_v40 = vsub.s32 32, %v1656_v38  ;;  %v1659_v3 = vshll.u32 %v2508_v63, %v1656_v38  ;;  %v1662_v59 = vshll.u32 %v2509_v1, %v1656_v38  ;;  %v1665_v41 = vshll.u32 %v2510_v4, %v1656_v38 }
 0x3bd   : > { %v1668_v35 = vshll.u32 %v2511_v6, %v1656_v38  ;;  %v1671_v61 = vshll.u32 %v2512_v8, %v1656_v38  ;;  %vm1674_vm2 = vcmp.lt.s32.totalorder %v1655_v11, 1  ;;  %vm1675_vm3 = vcmp.lt.s32.totalorder %v1655_v11, 2 }
 0x3be   : > { %v1660_v47 = vshrl.u32 %v2509_v1, %v1657_v40  ;;  %v1663_v27 = vshrl.u32 %v2510_v4, %v1657_v40  ;;  %v1666_v62 = vshrl.u32 %v2511_v6, %v1657_v40  ;;  %v1658_v57 = vshrl.u32 %v2508_v63, %v1657_v40 }
 0x3bf   : > { %v1669_v0 = vshrl.u32 %v2512_v8, %v1657_v40  ;;  %v1672_v30 = vshrl.u32 %v2513_v15, %v1657_v40  ;;  %vm1676_vm4 = vcmp.lt.s32.totalorder %v1655_v11, 3  ;;  %v1553_v18 = vsub.s32 32, %v1552_v34 }
 0x3c0   : > { %v1661_v54 = vor.u32 %v1660_v47, %v1659_v3  ;;  %v1664_v2 = vor.u32 %v1663_v27, %v1662_v59  ;;  %v1667_v24 = vor.u32 %v1666_v62, %v1665_v41  ;;  %vm1677_vm5 = vcmp.lt.s32.totalorder %v1655_v11, 4 }
 0x3c1   : > { %v1670_v23 = vor.u32 %v1669_v0, %v1668_v35  ;;  %v1673_v12 = vor.u32 %v1672_v30, %v1671_v61  ;;  %v1555_v19 = vshll.u32 %v2508_v63, %v1552_v34  ;;  %v1558_v50 = vshll.u32 %v2509_v1, %v1552_v34 }
 0x3c2   : > { %v1678_v49 = vsel %vm1674_vm2, %v1658_v57, %v1661_v54  ;;  %v1679_v13 = vsel %vm1677_vm5, %v1667_v24, 2102212464  ;;  %v1682_v14 = vsel %vm1674_vm2, %v1661_v54, %v1664_v2  ;;  %v1686_v55 = vsel %vm1674_vm2, %v1664_v2, %v1667_v24 }
 0x3c3   : > { %v1680_v17 = vsel %vm1676_vm4, %v1664_v2, %v1679_v13  ;;  %v1683_v16 = vsel %vm1677_vm5, %v1670_v23, 920167782  ;;  %v1687_v21 = vsel %vm1677_vm5, %v1673_v12, 1326507024  ;;  %v1554_v22 = vshrl.u32 %v2508_v63, %v1553_v18 }
 0x3c4   : > { %v1684_v29 = vsel %vm1676_vm4, %v1667_v24, %v1683_v16  ;;  %v1688_v56 = vsel %vm1676_vm4, %v1670_v23, %v1687_v21  ;;  %v1556_v7 = vshrl.u32 %v2509_v1, %v1553_v18  ;;  %v1681_v9 = vsel %vm1675_vm3, %v1678_v49, %v1680_v17 }
 0x3c5   : > { %v1685_v5 = vsel %vm1675_vm3, %v1682_v14, %v1684_v29  ;;  %v1689_v10 = vsel %vm1675_vm3, %v1686_v55, %v1688_v56  ;;  %v1559_v46 = vshrl.u32 %v2510_v4, %v1553_v18  ;;  %v1561_v39 = vshll.u32 %v2510_v4, %v1552_v34 }
 0x3c6   : > { %v3355_v28 = vmul.u32.u64.low %v3320_v53, %v1689_v10  ;;  %v3356_v51 = vmul.u32.u64.high %v3320_v53, %v1689_v10, %v3355_v28  ;;  %v3359_v36 = vmul.u32.u64.low %v3320_v53, %v1685_v5  ;;  %v3360_v37 = vmul.u32.u64.high %v3320_v53, %v1685_v5, %v3359_v36 }
 0x3c7   : > { %v1557_v20 = vor.u32 %v1556_v7, %v1555_v19  ;;  %v1560_v38 = vor.u32 %v1559_v46, %v1558_v50  ;;  %v1562_v40 = vshrl.u32 %v2511_v6, %v1553_v18  ;;  %v1697_v3 = vmul.u32 %v3320_v53, %v1681_v9 }
 0x3c8   : > { %v1564_v11 = vshll.u32 %v2511_v6, %v1552_v34  ;;  %v1565_v59 = vshrl.u32 %v2512_v8, %v1553_v18  ;;  %v1568_v41 = vshrl.u32 %v2513_v15, %v1553_v18  ;;  %v1567_v61 = vshll.u32 %v2512_v8, %v1552_v34 }
 0x3c9   : > { %v1563_v35 = vor.u32 %v1562_v40, %v1561_v39  ;;  %vm1570_vm6 = vcmp.lt.s32.totalorder %v3322_v31, 1  ;;  %vm1571_vm7 = vcmp.lt.s32.totalorder %v3322_v31, 2  ;;  %vm1699_vm8 = vc.u32 %v3356_v51, %v3359_v36 }
 0x3ca   : > { %v1700_v47 = vadd.s32 1, %v3360_v37  ;;  %v1566_v27 = vor.u32 %v1565_v59, %v1564_v11  ;;  %vm1572_vm9 = vcmp.lt.s32.totalorder %v3322_v31, 3  ;;  %v1569_v53 = vor.u32 %v1568_v41, %v1567_v61 }
 0x3cb   : > { %vm1573_vm10 = vcmp.lt.s32.totalorder %v3322_v31, 4  ;;  %v1574_v62 = vsel %vm1570_vm6, %v1554_v22, %v1557_v20  ;;  %v1578_v57 = vsel %vm1570_vm6, %v1557_v20, %v1560_v38  ;;  %v1582_v54 = vsel %vm1570_vm6, %v1560_v38, %v1563_v35 }
 0x3cc   : > { %v1701_v0 = vsel %vm1699_vm8, %v1700_v47, %v3360_v37  ;;  %v1575_v30 = vsel %vm1573_vm10, %v1563_v35, 2102212464  ;;  %v1579_v34 = vsel %vm1573_vm10, %v1566_v27, 920167782  ;;  %v1583_v23 = vsel %vm1573_vm10, %v1569_v53, 1326507024 }
 0x3cd   : > { %v1702_v2 = vadd.s32 %v1701_v0, %v1697_v3  ;;  %v1576_v24 = vsel %vm1572_vm9, %v1560_v38, %v1575_v30  ;;  %v1580_v18 = vsel %vm1572_vm9, %v1563_v35, %v1579_v34  ;;  %v1584_v19 = vsel %vm1572_vm9, %v1566_v27, %v1583_v23 }
 0x3ce   : > { %v1581_v12 = vsel %vm1571_vm7, %v1578_v57, %v1580_v18  ;;  %vm1861_vm11 = vcmp.gt.s32.totalorder %v3329_v26, 0  ;;  %v1749_v49 = vand.u32 2139095040, %v3309_v58  ;;  %v1585_v14 = vsel %vm1571_vm7, %v1582_v54, %v1584_v19 }
 0x3cf   : > { %v1703_v13 = vadd.s32 536870912, %v1702_v2  ;;  %v3383_v55 = vmul.u32.u64.low %v3324_v42, %v1581_v12  ;;  %v3384_v17 = vmul.u32.u64.high %v3324_v42, %v1581_v12, %v3383_v55  ;;  %v1577_v16 = vsel %vm1571_vm7, %v1574_v62, %v1576_v24 }
 0x3d0   : > { %v3390_v21 = vmul.u32.u64.low %v3324_v42, %v1585_v14  ;;  %v3391_v50 = vmul.u32.u64.high %v3324_v42, %v1585_v14, %v3390_v21  ;;  %v1862_v29 = vsel %vm1861_vm11, %v3329_v26, 0  ;;  %v3397_v7 = vadd.s32 %v3359_v36, %v3356_v51 }
 0x3d1   : > { %v3394_v56 = vshrl.u32 %v1703_v13, 30  ;;  %v1864_v22 = vand.u32 31, %v1862_v29  ;;  %v3401_v9 = vshll.u32 %v1858_v43, 8  ;;  %v1750_v5 = vshrl.u32 %v1749_v49, 23 }
 0x3d2   : > { %v3405_v31 = vand.u32 8388607, %v1746_v45  ;;  %v1593_v46 = vmul.u32 %v3324_v42, %v1577_v16  ;;  %v1596_v26 = vadd.s32 1, %v3384_v17  ;;  %vm1595_vm12 = vc.u32 %v3391_v50, %v3383_v55 }
 0x3d3   : > { %v1705_v10 = vshll.u32 %v3394_v56, 30  ;;  %v1865_v28 = vsub.s32 32, %v1864_v22  ;;  %v1863_v51 = vshrl.u32 %v1862_v29, 5  ;;  %v1867_v32 = vshll.u32 %v2508_v63, %v1864_v22 }
 0x3d4   : > { %v1870_v43 = vshll.u32 %v2509_v1, %v1864_v22  ;;  %v1597_v37 = vsel %vm1595_vm12, %v1596_v26, %v3384_v17  ;;  %v1873_v38 = vshll.u32 %v2510_v4, %v1864_v22  ;;  %v1876_v3 = vshll.u32 %v2511_v6, %v1864_v22 }
 0x3d5   : > { %v3414_v36 = vsub.s32 %v1702_v2, %v1705_v10  ;;  %v1868_v20 = vshrl.u32 %v2509_v1, %v1865_v28  ;;  %v1598_v42 = vadd.s32 %v1597_v37, %v1593_v46  ;;  %v1871_v39 = vshrl.u32 %v2510_v4, %v1865_v28 }
 0x3d6   : > { %v1874_v40 = vshrl.u32 %v2511_v6, %v1865_v28  ;;  %v1877_v41 = vshrl.u32 %v2512_v8, %v1865_v28  ;;  %v1879_v35 = vshll.u32 %v2512_v8, %v1864_v22  ;;  %v1880_v53 = vshrl.u32 %v2513_v15, %v1865_v28 }
 0x3d7   : > { %v1708_v11 = vsub.s32 0, %v3414_v36  ;;  %v1869_v59 = vor.u32 %v1868_v20, %v1867_v32  ;;  %v1599_v61 = vadd.s32 536870912, %v1598_v42  ;;  %v1872_v47 = vor.u32 %v1871_v39, %v1870_v43 }
 0x3d8   : > { %v1875_v27 = vor.u32 %v1874_v40, %v1873_v38  ;;  %v1866_v57 = vshrl.u32 %v2508_v63, %v1865_v28  ;;  %v1878_v0 = vor.u32 %v1877_v41, %v1876_v3  ;;  %v2184_v30 = vadd.s32 4294967169, %v1750_v5 }
 0x3d9   : > { %v2181_v62 = vmin.u32 %v1708_v11, %v3414_v36  ;;  %v3428_v34 = vshrl.u32 %v1599_v61, 30  ;;  %v1881_v54 = vor.u32 %v1880_v53, %v1879_v35  ;;  %vm1882_vm14 = vcmp.lt.s32.totalorder %v1863_v51, 1 }
 0x3da   : > { %vm1885_vm15 = vcmp.lt.s32.totalorder %v1863_v51, 4  ;;  %vm1883_vm0 = vcmp.lt.s32.totalorder %v1863_v51, 2  ;;  %v1890_v18 = vsel %vm1882_vm14, %v1869_v59, %v1872_v47  ;;  %vm1884_vm1 = vcmp.lt.s32.totalorder %v1863_v51, 3 }
 0x3db   : > { %v1710_v2 = vclz %v2181_v62  ;;  %v1887_v24 = vsel %vm1885_vm15, %v1875_v27, 2102212464  ;;  %v1601_v23 = vshll.u32 %v3428_v34, 30  ;;  %v1891_v12 = vsel %vm1885_vm15, %v1878_v0, 920167782 }
 0x3dc   : > { %v1894_v19 = vsel %vm1882_vm14, %v1872_v47, %v1875_v27  ;;  %v1886_v13 = vsel %vm1882_vm14, %v1866_v57, %v1869_v59  ;;  %v1892_v14 = vsel %vm1884_vm1, %v1875_v27, %v1891_v12  ;;  %v1895_v17 = vsel %vm1885_vm15, %v1881_v54, 1326507024 }
 0x3dd   : > { %v2182_v49 = vadd.s32 4294967294, %v1710_v2  ;;  %v3431_v16 = vsub.s32 %v1598_v42, %v1601_v23  ;;  %v1888_v21 = vsel %vm1884_vm1, %v1872_v47, %v1887_v24  ;;  %v1893_v29 = vsel %vm1883_vm0, %v1890_v18, %v1892_v14 }
 0x3de   : > { %v1896_v22 = vsel %vm1884_vm1, %v1878_v0, %v1895_v17  ;;  %v3436_v10 = vmul.u32.u64.low %v3401_v9, %v1893_v29  ;;  %v3437_v46 = vmul.u32.u64.high %v3401_v9, %v1893_v29, %v3436_v10  ;;  %v1889_v38 = vsel %vm1883_vm0, %v1886_v13, %v1888_v21 }
 0x3df   : > { %vm2183_vm2 = vcmp.lt.s32.totalorder %v2182_v49, 0  ;;  %v1897_v5 = vsel %vm1883_vm0, %v1894_v19, %v1896_v22  ;;  %v1604_v28 = vsub.s32 0, %v3431_v16  ;;  %v1756_v42 = vadd.s32 1, %v2184_v30 }
 0x3e0   : > { %v1713_v26 = vsel %vm2183_vm2, 0, %v2182_v49  ;;  %v3442_v32 = vmul.u32.u64.low %v3401_v9, %v1897_v5  ;;  %v3443_v43 = vmul.u32.u64.high %v3401_v9, %v1897_v5, %v3442_v32  ;;  %v1754_v3 = vor.u32 8388608, %v3405_v31 }
 0x3e1   : > { %v1714_v37 = vsub.s32 32, %v1713_v26  ;;  %v1718_v20 = vsub.s32 4294967266, %v1713_v26  ;;  %v1715_v39 = vshll.u32 %v3414_v36, %v1713_v26  ;;  %v2177_v40 = vmin.u32 %v1604_v28, %v3431_v16 }
 0x3e2   : > { %v1908_v41 = vadd.s32 1, %v3437_v46  ;;  %vm1757_vm3 = vcmp.gt.s32.totalorder %v1756_v42, 0  ;;  %v1905_v61 = vmul.u32 %v3401_v9, %v1889_v38  ;;  %vm1907_vm4 = vc.u32 %v3443_v43, %v3436_v10 }
 0x3e3   : > { %v1716_v11 = vshrl.u32 %v3397_v7, %v1714_v37  ;;  %v1719_v59 = vadd.s32 127, %v1718_v20  ;;  %v1606_v35 = vclz %v2177_v40  ;;  %v1758_v51 = vsel %vm1757_vm3, %v1756_v42, 0 }
 0x3e4   : > { %v1594_v36 = vadd.s32 %v3383_v55, %v3391_v50  ;;  %v1909_v31 = vsel %vm1907_vm4, %v1908_v41, %v3437_v46  ;;  %vm1644_vm5 = vcmp.lt.s32.totalorder %v3293_v52, 0  ;;  %v3458_v62 = vshrl.u32 %v1758_v51, 5 }
 0x3e5   : > { %v1717_v47 = vor.u32 %v1716_v11, %v1715_v39  ;;  %v1720_v27 = vshll.u32 %v1719_v59, 23  ;;  %v2178_v7 = vadd.s32 4294967294, %v1606_v35  ;;  %v1910_v53 = vadd.s32 %v1909_v31, %v1905_v61 }
 0x3e6   : > { %v1760_v57 = vand.u32 31, %v1758_v51  ;;  %vm3462_vm6 = vcmp.le.f32.partialorder %v1642_v60, 0.7853982  ;;  %v3466_v30 = vshll.u32 %v1754_v3, 8  ;;  %v1624_v55 = vsub.s32 4, %v3428_v34 }
 0x3e7   : > { %v1721_v0 = vor.u32 4788187, %v1720_v27  ;;  %v1728_v50 = vsub.s32 4, %v3394_v56  ;;  %v1724_v54 = vcvt.s32.f32 %v1717_v47  ;;  %vm2179_vm7 = vcmp.lt.s32.totalorder %v2178_v7, 0 }
 0x3e8   : > { %v1911_v2 = vadd.s32 536870912, %v1910_v53  ;;  %v1761_v24 = vsub.s32 32, %v1760_v57  ;;  %v1609_v23 = vsel %vm2179_vm7, 0, %v2178_v7  ;;  %v1763_v12 = vshll.u32 %v2508_v63, %v1760_v57 }
 0x3e9   : > { %v1722_v18 = vand.u32 2147483647, %v1721_v0  ;;  %v1766_v60 = vshll.u32 %v2509_v1, %v1760_v57  ;;  %v1610_v19 = vsub.s32 32, %v1609_v23  ;;  %v1614_v49 = vsub.s32 4294967266, %v1609_v23 }
 0x3ea   : > { %v3472_v13 = vshrl.u32 %v1911_v2, 30  ;;  %v1769_v14 = vshll.u32 %v2510_v4, %v1760_v57  ;;  %vm1778_vm8 = vcmp.lt.s32.totalorder %v3458_v62, 1  ;;  %v1611_v21 = vshll.u32 %v3431_v16, %v1609_v23 }
 0x3eb   : > { %v1725_v17 = vmul.f32 %v1724_v54, %v1722_v18  ;;  %v1764_v29 = vshrl.u32 %v2509_v1, %v1761_v24  ;;  %v1767_v22 = vshrl.u32 %v2510_v4, %v1761_v24  ;;  %v1612_v5 = vshrl.u32 %v1594_v36, %v1610_v19 }
 0x3ec   : > { %v1615_v46 = vadd.s32 127, %v1614_v49  ;;  %v1913_v26 = vshll.u32 %v3472_v13, 30  ;;  %v1770_v28 = vshrl.u32 %v2511_v6, %v1761_v24  ;;  %v1772_v38 = vshll.u32 %v2511_v6, %v1760_v57 }
 0x3ed   : > { %v1726_v32 = vxor.u32 2147483648, %v1725_v17  ;;  %v1765_v37 = vor.u32 %v1764_v29, %v1763_v12  ;;  %v1768_v20 = vor.u32 %v1767_v22, %v1766_v60  ;;  %vm1540_vm9 = vcmp.lt.s32.totalorder %v3295_v48, 0 }
 0x3ee   : > { %v1613_v42 = vor.u32 %v1612_v5, %v1611_v21  ;;  %v1616_v39 = vshll.u32 %v1615_v46, 23  ;;  %v3483_v16 = vsub.s32 %v1910_v53, %v1913_v26  ;;  %v1771_v1 = vor.u32 %v1770_v28, %v1769_v14 }
 0x3ef   : > { %v1727_v4 = vsel %vm1644_vm5, %v1726_v32, %v1725_v17  ;;  %v1773_v40 = vshrl.u32 %v2512_v8, %v1761_v24  ;;  %v1775_v3 = vshll.u32 %v2512_v8, %v1760_v57  ;;  %v1776_v11 = vshrl.u32 %v2513_v15, %v1761_v24 }
 0x3f0   : > { %v1730_v6 = vsel %vm3462_vm6, %v3293_v52, %v1727_v4  ;;  %vm3495_vm10 = vcmp.le.f32.partialorder %v1538_v33, 0.7853982  ;;  %v1617_v41 = vor.u32 4788187, %v1616_v39  ;;  %v1916_v35 = vsub.s32 0, %v3483_v16 }
 0x3f1   : > { %v1762_v61 = vshrl.u32 %v2508_v63, %v1761_v24  ;;  %2427 = vcosq.f32 %v1730_v6  ;;  %v1620_v51 = vcvt.s32.f32 %v1613_v42  ;;  %v1774_v8 = vor.u32 %v1773_v40, %v1772_v38 }
 0x3f2   : > { %v1777_v47 = vor.u32 %v1776_v11, %v1775_v3  ;;  %2429 = vsinq.f32 %v1730_v6  ;;  %v1618_v15 = vand.u32 2147483647, %v1617_v41  ;;  %v2189_v27 = vmin.u32 %v1916_v35, %v3483_v16 }
 0x3f3   : > { %vm1781_vm11 = vcmp.lt.s32.totalorder %v3458_v62, 4  ;;  %vm1780_vm12 = vcmp.lt.s32.totalorder %v3458_v62, 3  ;;  %v1786_v36 = vsel %vm1778_vm8, %v1765_v37, %v1768_v20  ;;  %vm1779_vm14 = vcmp.lt.s32.totalorder %v3458_v62, 2 }
 0x3f4   : > { %v1783_v33 = vsel %vm1781_vm11, %v1771_v1, 2102212464  ;;  %v1787_v31 = vsel %vm1781_vm11, %v1774_v8, 920167782  ;;  %v1621_v7 = vmul.f32 %v1620_v51, %v1618_v15  ;;  %v1918_v53 = vclz %v2189_v27 }
 0x3f5   : > { %v1788_v63 = vsel %vm1780_vm12, %v1771_v1, %v1787_v31  ;;  %v1782_v57 = vsel %vm1778_vm8, %v1762_v61, %v1765_v37  ;;  %v1790_v54 = vsel %vm1778_vm8, %v1768_v20, %v1771_v1  ;;  %v1791_v2 = vsel %vm1781_vm11, %v1777_v47, 1326507024 }
 0x3f6   : > { %v1789_v0 = vsel %vm1779_vm14, %v1786_v36, %v1788_v63  ;;  %v1622_v24 = vxor.u32 2147483648, %v1621_v7  ;;  %v2190_v18 = vadd.s32 4294967294, %v1918_v53  ;;  %v1784_v23 = vsel %vm1780_vm12, %v1768_v20, %v1783_v33 }
 0x3f7   : > { %v1792_v12 = vsel %vm1780_vm12, %v1774_v8, %v1791_v2  ;;  %v3516_v19 = vmul.u32.u64.low %v3466_v30, %v1789_v0  ;;  %v3517_v49 = vmul.u32.u64.high %v3466_v30, %v1789_v0, %v3516_v19  ;;  %v1625_v14 = vsel %vm1540_vm9, %v1624_v55, %v3428_v34 }
 0x3f8   : > { %v1793_v60 = vsel %vm1779_vm14, %v1790_v54, %v1792_v12  ;;  %v1623_v17 = vsel %vm1540_vm9, %v1622_v24, %v1621_v7  ;;  %vm2191_vm15 = vcmp.lt.s32.totalorder %v2190_v18, 0  ;;  %v1785_v46 = vsel %vm1779_vm14, %v1782_v57, %v1784_v23 }
 0x3f9   : > { %v3528_v21 = vmul.u32.u64.low %v3466_v30, %v1793_v60  ;;  %v3529_v29 = vmul.u32.u64.high %v3466_v30, %v1793_v60, %v3528_v21  ;;  %v1626_v22 = vsel %vm3495_vm10, %v3295_v48, %v1623_v17  ;;  %v1921_v5 = vsel %vm2191_vm15, 0, %v2190_v18 }
 0x3fa   : > { %v1729_v34 = vsel %vm1644_vm5, %v1728_v50, %v3394_v56  ;;  %2431 = vcosq.f32 %v1626_v22  ;;  %v1926_v55 = vsub.s32 4294967266, %v1921_v5  ;;  %v1627_v26 = vsel %vm3495_vm10, 0, %v1625_v14 }
 0x3fb   : > { %v2428_v28 = vpop.eup %2427  ;;  %2433 = vsinq.f32 %v1626_v22  ;;  %v1804_v32 = vadd.s32 1, %v3517_v49  ;;  %v1731_v37 = vsel %vm3462_vm6, 0, %v1729_v34  ;;  %v1922_v20 = vsub.s32 32, %v1921_v5 }
 0x3fc   : > { %v2430_v62 = vpop.eup %2429  ;;  %v1927_v38 = vadd.s32 127, %v1926_v55  ;;  %v1801_v42 = vmul.u32 %v3466_v30, %v1785_v46  ;;  %vm1803_vm0 = vc.u32 %v3529_v29, %v3516_v19  ;;  %v1631_v50 = vadd.s32 3, %v1627_v26 }
 0x3fd   : > { %v1805_v56 = vsel %vm1803_vm0, %v1804_v32, %v3517_v49  ;;  %v1906_v39 = vadd.s32 %v3436_v10, %v3443_v43  ;;  %v1735_v40 = vadd.s32 3, %v1731_v37  ;;  %v1739_v3 = vxor.u32 2147483648, %v2430_v62 }
 0x3fe   : > { %v1928_v1 = vshll.u32 %v1927_v38, 23  ;;  %v1806_v4 = vadd.s32 %v1805_v56, %v1801_v42  ;;  %v1742_v59 = vxor.u32 2147483648, %v2428_v28  ;;  %v1632_v41 = vand.u32 3, %v1631_v50 }
 0x3ff   : > { %v1924_v9 = vshrl.u32 %v1906_v39, %v1922_v20  ;;  %v1736_v6 = vand.u32 3, %v1735_v40  ;;  %v1923_v30 = vshll.u32 %v3483_v16, %v1921_v5  ;;  %vm1734_vm5 = vweird.f32 %v3293_v52 }
 0x400   : > { %v1807_v11 = vadd.s32 536870912, %v1806_v4  ;;  %v1929_v35 = vor.u32 4788187, %v1928_v1  ;;  %vm1637_vm4 = vcmp.eq.s32.totalorder %v1632_v41, 2  ;;  %vm1634_vm6 = vcmp.eq.s32.totalorder %v1632_v41, 0 }
 0x401   : > { %vm1738_vm1 = vcmp.eq.s32.totalorder %v1736_v6, 0  ;;  %vm1741_vm2 = vcmp.eq.s32.totalorder %v1736_v6, 2  ;;  %v1925_v47 = vor.u32 %v1924_v9, %v1923_v30  ;;  %vm1737_vm3 = vcmp.lt.s32.totalorder %v1736_v6, 2 }
 0x402   : > { %v3553_v61 = vshrl.u32 %v1807_v11, 30  ;;  %v1740_v51 = vsel %vm1738_vm1, %v2428_v28, %v1739_v3  ;;  %v1743_v43 = vsel %vm1741_vm2, %v1742_v59, %v2430_v62  ;;  %v1930_v36 = vand.u32 2147483647, %v1929_v35 }
 0x403   : > { %v1744_v33 = vsel %vm1737_vm3, %v1740_v51, %v1743_v43  ;;  %v1932_v63 = vcvt.s32.f32 %v1925_v47  ;;  %vm1633_vm7 = vcmp.lt.s32.totalorder %v1632_v41, 2  ;;  %vm1630_vm8 = vweird.f32 %v3295_v48 }
 0x404   : > { %v2432_v8 = vpop.eup %2431  ;;  %v1809_v10 = vshll.u32 %v3553_v61, 30  ;;  %v1745_v7 = vsel %vm1734_vm5, nan, %v1744_v33  ;;  %vm1852_vm10 = vcmp.lt.s32.totalorder %v3303_v44, 0  ;;  %v1802_v48 = vadd.s32 %v3516_v19, %v3529_v29 }
 0x405   : > { %v2434_v15 = vpop.eup %2433  ;;  %v1638_v27 = vxor.u32 2147483648, %v2432_v8  ;;  %v1933_v2 = vmul.f32 %v1932_v63, %v1930_v36  ;;  %vm3565_vm11 = vcmp.le.f32.partialorder %v1850_v25, 0.7853982  ;;  %v1936_v32 = vsub.s32 4, %v3472_v13  ;;  %v1955_v36 = vld [vmem:[%s3647_s7 + $0x8] sm:$0xff] }
 0x406   : > { %v1810_v16 = vsub.s32 %v1806_v4, %v1809_v10  ;;  %v1635_v31 = vxor.u32 2147483648, %v2434_v15  ;;  %v1832_v20 = vsub.s32 4, %v3553_v61  ;;  %vm1748_vm12 = vcmp.lt.s32.totalorder %v3309_v58, 0 }
 0x407   : > { %v1639_v53 = vsel %vm1637_vm4, %v1638_v27, %v2434_v15  ;;  %v1934_v52 = vxor.u32 2147483648, %v1933_v2  ;;  %v1937_v25 = vsel %vm1852_vm10, %v1936_v32, %v3472_v13  ;;  %vm1747_vm14 = vcmp.le.f32.partialorder %v1746_v45, 0.7853982 }
 0x408   : > { %v1812_v57 = vsub.s32 0, %v1810_v16  ;;  %v1636_v0 = vsel %vm1634_vm6, %v2432_v8, %v1635_v31  ;;  %v1939_v42 = vsel %vm3565_vm11, 0, %v1937_v25  ;;  %v1833_v50 = vsel %vm1748_vm12, %v1832_v20, %v3553_v61 }
 0x409   : > { %v1640_v54 = vsel %vm1633_vm7, %v1636_v0, %v1639_v53  ;;  %v1935_v14 = vsel %vm1852_vm10, %v1934_v52, %v1933_v2  ;;  %v1943_v1 = vadd.s32 3, %v1939_v42  ;;  %v1835_v40 = vsel %vm1747_vm14, 0, %v1833_v50 }
 0x40a   : > { %v2185_v24 = vmin.u32 %v1812_v57, %v1810_v16  ;;  %v1641_v18 = vsel %vm1630_vm8, nan, %v1640_v54  ;;  %v1938_v55 = vsel %vm3565_vm11, %v3303_v44, %v1935_v14  ;;  %v1839_v9 = vadd.s32 3, %v1835_v40 }
 0x40b   : > { %v2288_v23 = vpack.c.bf16 %v1745_v7, %v1641_v18  ;;  %2435 = vcosq.f32 %v1938_v55  ;;  %v1944_v3 = vand.u32 3, %v1943_v1  ;;  %vm1942_vm4 = vweird.f32 %v3303_v44  ;;  %v1966_v44 = vpop.permute.xlu1 %1965 }
 0x40c   : > { %v1814_v12 = vclz %v2185_v24  ;;  %2437 = vsinq.f32 %v1938_v55  ;;  %v1840_v59 = vand.u32 3, %v1839_v9  ;;  %vm1838_vm6 = vweird.f32 %v3309_v58 }
 0x40d   : > { %2289 = vmatprep.subr.bf16.mxu1 %v2288_v23  ;;  %vm1946_vm15 = vcmp.eq.s32.totalorder %v1944_v3, 0  ;;  %vm1949_vm0 = vcmp.eq.s32.totalorder %v1944_v3, 2  ;;  %vm1945_vm1 = vcmp.lt.s32.totalorder %v1944_v3, 2 }
 0x40e   : > { %v2186_v60 = vadd.s32 4294967294, %v1814_v12  ;;  %2291 = vmatpush3.bf16.msra.mxu1 %v2288_v23  ;;  %vm1845_vm2 = vcmp.eq.s32.totalorder %v1840_v59, 2  ;;  %vm1842_vm3 = vcmp.eq.s32.totalorder %v1840_v59, 0  ;;  %vm1841_vm5 = vcmp.lt.s32.totalorder %v1840_v59, 2 }
 0x410   : > { %vm2187_vm9 = vcmp.lt.s32.totalorder %v2186_v60, 0 }
 0x411   : > { %v1817_v49 = vsel %vm2187_vm9, 0, %v2186_v60 }
 0x412   : > { %v1818_v17 = vsub.s32 32, %v1817_v49  ;;  %v1822_v21 = vsub.s32 4294967266, %v1817_v49  ;;  %v1819_v5 = vshll.u32 %v1810_v16, %v1817_v49 }
 0x414   : > { %v1820_v46 = vshrl.u32 %v1802_v48, %v1818_v17  ;;  %v1823_v34 = vadd.s32 127, %v1822_v21 }
 0x415   : > { %v2436_v4 = vpop.eup %2435 }
 0x416   : > { %v1821_v26 = vor.u32 %v1820_v46, %v1819_v5  ;;  %v1824_v28 = vshll.u32 %v1823_v34, 23  ;;  %v2438_v13 = vpop.eup %2437  ;;  %v1950_v6 = vxor.u32 2147483648, %v2436_v4 }
 0x417   : > { %v1947_v11 = vxor.u32 2147483648, %v2438_v13 }
 0x418   : > { %v1825_v19 = vor.u32 4788187, %v1824_v28  ;;  %v1828_v37 = vcvt.s32.f32 %v1821_v26  ;;  %v1951_v45 = vsel %vm1949_vm0, %v1950_v6, %v2438_v13 }
 0x419   : > { %v1948_v41 = vsel %vm1946_vm15, %v2436_v4, %v1947_v11 }
 0x41a   : > { %v1826_v29 = vand.u32 2147483647, %v1825_v19  ;;  %v1952_v51 = vsel %vm1945_vm1, %v1948_v41, %v1951_v45 }
 0x41b   : > { %v1953_v43 = vsel %vm1942_vm4, nan, %v1952_v51 }
 0x41c   : > { %v1829_v62 = vmul.f32 %v1828_v37, %v1826_v29 }
 0x41e   : > { %v1830_v38 = vxor.u32 2147483648, %v1829_v62 }
 0x420   : > { %v1831_v56 = vsel %vm1748_vm12, %v1830_v38, %v1829_v62 }
 0x421   : > { %v1834_v39 = vsel %vm1747_vm14, %v3309_v58, %v1831_v56  ;;  %v1961_v58 = vpop.permute.xlu0 %1960 }
 0x422   : > { %2439 = vcosq.f32 %v1834_v39 }
 0x423   : > { %2441 = vsinq.f32 %v1834_v39 }
 0x42c   : > { %v2440_v30 = vpop.eup %2439 }
 0x42d   : > { %v2442_v35 = vpop.eup %2441  ;;  %v1846_v61 = vxor.u32 2147483648, %v2440_v30 }
 0x42e   : > { %v1843_v8 = vxor.u32 2147483648, %v2442_v35 }
 0x42f   : > { %v1847_v47 = vsel %vm1845_vm2, %v1846_v61, %v2442_v35 }
 0x430   : > { %v1844_v10 = vsel %vm1842_vm3, %v2440_v30, %v1843_v8 }
 0x431   : > { %v1848_v15 = vsel %vm1841_vm5, %v1844_v10, %v1847_v47 }
 0x432   : > { %v1849_v27 = vsel %vm1838_vm6, nan, %v1848_v15 }
 0x433   : > { %v2292_v33 = vpack.c.bf16 %v1953_v43, %v1849_v27 }
 0x435   : > { %2293 = vmatprep.subr.bf16.mxu1 %v2292_v33 }
 0x436   : > { %2295 = vmatpush3.bf16.msra.mxu1 %v2292_v33 }
 0x439   : > { %2270 = vmatmul.mubr.msk.f32.vlgmr.msra.gmra.mrb[4].mxu1 %vm899_vm13, %v1955_v36 }
 0x50c   : > { %v2271_v16 = vpop.f32.mrb[4].mxu1 }
 0x50d   : > { %v2046_v31 = vadd.f32 %v2271_v16, %v1966_v44  ;;  %v2040_v7 = vpop.f32.mrb[5].mxu1 }
 0x50e   : > { %v2041_v53 = vadd.f32 %v2040_v7, %v1961_v58 }
 0x50f   : > { %2050 = vst [vmem:[%s323_s17 + $0x8] sm:$0xff] %v2046_v31 }
 0x510   : > { %2049 = vst [vmem:[%s323_s17] sm:$0xff] %v2041_v53 }
 0x511   : > { %2456 = shalt.err (!%p2453_p3)
}
 0x512   : > { %s2457_s29 = scalar_lea.hbm %s3597_s24, 256  ;;  %s2461_s17 = scalar_lea.hbm %s3649_s9, 768 }
 0x513   : > { %p2458_p4 = scmp.ne.s32.totalorder %s3597_s24, %s2457_s29  ;;  %p2462_p9 = scmp.lt.u32.totalorder %s3597_s24, %s3649_s9 }
 0x514   : > { %p2463_p10 = scmp.lt.u32.totalorder %s2461_s17, %s2457_s29  ;;  %p2465_p12 = scmp.lt.u32.totalorder %s2457_s29, %s3597_s24 }
 0x515   : > { %p2459_p7 = pnand %p2458_p4, %p2606_p5 }
 0x516   : > { %p2464_p11 = por %p2463_p10, %p2462_p9 }
 0x517   : > { %p2460_p8 = pneg %p2459_p7 }
 0x518   : > { %p2466_p13 = por %p2465_p12, %p2464_p11 }
 0x51a   : > { %p2467_p0 = pnand %p2466_p13, %p2460_p8 }
 0x51c   : > { %2470 = shalt.err (!%p2467_p0)
}
 0x51d   : > { %s2515_s23 = smov 128   ;;  %s2516_s13 = smov 384  }
 0x51e   : > { %s2517_s26 = smov 8  }
 0x51f   : > { %2344 = dma.vmem_to_hbm [thread:$0]  (%p2606_p5), %s3592_s18, 256, %s3597_s24, %s3599_s25, %s2515_s23, %s2516_s13, %s2517_s26  }
 0x520 PF: > { %p2350_p1 = scmp.ge.s32.totalorder %s2505_s12, 2  ;;  %s2079_s27 = sand.u32 1, %s2493_s30  }
 0x521   : > { %s2080_s28 = scalar_lea.sflag [#allocation3], %s2079_s27 }
 0x522   : > { %p2347_p2 = pnand %p2350_p1, %p2610_p6 }
 0x524   : > { %2488 = dma.done.wait (!%p2347_p2), %s2080_s28, 256  }
 0x525   : > { %2490 = vsyncadd (!%p2347_p2), %s2080_s28, 4294967040  ;;  %s3671_s29 = sld [smem:[#allocation5_spill]]  ;;  %p19_p3 = scmp.ge.s32.totalorder %s2593_s15, 5  }
 0x526   : > { %s3672_s30 = smov %s2497_s10  ;;  %s3673_s10 = smov %s2501_s11 }
 0x527   : > { %s3675_s12 = smov %s2593_s15  ;;  %21 = sbr.rel (!%p19_p3) target bundleno = 3 (0x3), region = 91 }
 0x52b   : > { %s3674_s11 = smov %s3671_s29 }
 0x52e   :  { %2085 = vsyncpa [#allocation3], 1 }
 0x52f   :  { %2087 = vsyncpa [#allocation3 + $0x1], 1 }

</bundles_post_ra>
